<compile_context>
chip_gen: v7x
topology: tpu7x:2x2x1
jax: 0.10.0
libtpu: 0.0.40
codegen_flags: <defaults>
</compile_context>

<pallas_src>
import functools
import numpy as np

import jax
import jax.numpy as jnp
from jax import lax
from jax.experimental import pallas as pl
from jax.experimental.pallas import tpu as pltpu


# ----------------------------------------------------------------------------
# Fused DecoderBlock kernel  (one (batch, q-tile) block per grid step)
# ----------------------------------------------------------------------------

def _decoder_block_kernel(
    # batched inputs
    x_ref, val_ref, key_ref, smask_ref, tmask_ref,
    # masked self-attention (decoder) weights: block-diag bf16 projections, Wo^T, bias, LN
    sa_wq_ref, sa_wk_ref, sa_wv_ref, sa_wo_ref, sa_bo_ref, n0_g_ref, n0_b_ref,
    # cross-attention (transformer block) weights
    ca_wq_ref, ca_wk_ref, ca_wv_ref, ca_wo_ref, ca_bo_ref, n1_g_ref, n1_b_ref,
    # feed-forward (pre-transposed, bf16) + LN
    w1_ref, b1_ref, w2_ref, b2_ref, n2_g_ref, n2_b_ref,
    # output + scratch
    out_ref, ctx_ref,
    *, heads, head_dim, q_tile, num_q_tiles, causal_trg, eps):
    """x: (1, Lq, E); val/key: (1, Lk, E); smask/tmask: compact additive f32 masks.
    All projection weights are pre-transposed bf16 (kernel computes act @ W, no transpose).
    ctx_ref: (q_tile, E) f32 VMEM scratch for the per-head attention contexts."""

    f32 = jnp.float32
    bf16 = jnp.bfloat16

    def layer_norm(z, g_ref, b_ref):
        mu = jnp.mean(z, axis=-1, keepdims=True)
        zc = z - mu
        var = jnp.mean(zc * zc, axis=-1, keepdims=True)
        return zc * lax.rsqrt(var + eps) * g_ref[...] + b_ref[...]

    def attention(q_in, k_in, v_in, add_mask, wq_ref, wk_ref, wv_ref, woT_ref, bo_ref):
        # q_in: (tq, E) f32; k_in/v_in: (Lk, E) f32; add_mask broadcastable to (tq, Lk), f32.
        qb = q_in.astype(bf16)
        kb = k_in.astype(bf16)
        vb = v_in.astype(bf16)
        # Lane-dense block-diagonal projections (shared per-head weight of the reference
        # module); 1/sqrt(embed) is already folded into wq. bf16 operands, f32 accumulate.
        qp = jnp.dot(qb, wq_ref[...], preferred_element_type=f32).astype(bf16)  # (tq, E)
        kp = jnp.dot(kb, wk_ref[...], preferred_element_type=f32).astype(bf16)  # (Lk, E)
        vp = jnp.dot(vb, wv_ref[...], preferred_element_type=f32).astype(bf16)  # (Lk, E)

        for h in range(heads):            # static unroll; heads is small (TODO: fori_loop if large)
            lo = h * head_dim
            hi = lo + head_dim
            # energy_h = (scale*Q_h) @ K_h^T  (contract last dims; no in-kernel transpose)
            e = lax.dot_general(qp[:, lo:hi], kp[:, lo:hi],
                                (((1,), (1,)), ((), ())),
                                preferred_element_type=f32)       # (tq, Lk)
            e = e + add_mask
            e = e - jnp.max(e, axis=-1, keepdims=True)
            p = jnp.exp(e)
            p = p * pl.reciprocal(jnp.sum(p, axis=-1, keepdims=True), approx=True)
            ctx_ref[:, lo:hi] = jnp.dot(p.astype(bf16), vp[:, lo:hi],
                                        preferred_element_type=f32)              # (tq, hd)
        # fc_out(concat(heads)) as ONE full-depth matmul against Wo^T.
        return jnp.dot(ctx_ref[...].astype(bf16), woT_ref[...],
                       preferred_element_type=f32) + bo_ref[...]

    qi = pl.program_id(1)
    x_full = x_ref[0]                      # (Lq, E) f32 -- keys/values for self-attention
    lq = x_full.shape[0]

    if num_q_tiles == 1:
        q0 = 0
        q_in = x_full                      # (tq, E) query tile == full sequence
    else:
        q0 = pl.multiple_of(qi * q_tile, q_tile)
        q_in = x_full[pl.ds(q0, q_tile), :]

    # Target (self-attention) additive mask: causal generated in-kernel (no DMA),
    # otherwise a compact additive array loaded from tmask_ref.
    if causal_trg:
        rows = q0 + lax.broadcasted_iota(jnp.int32, (q_tile, lq), 0)
        cols = lax.broadcasted_iota(jnp.int32, (q_tile, lq), 1)
        trg_add = jnp.where(rows >= cols, 0.0, -1e20).astype(f32)
    else:
        trg_add = tmask_ref[0]             # (1 or tq, Lq), broadcasts over rows if needed

    # DecoderBlock: masked self-attention -> LN -> residual  => query
    sa = attention(q_in, x_full, x_full, trg_add,
                   sa_wq_ref, sa_wk_ref, sa_wv_ref, sa_wo_ref, sa_bo_ref)
    query = q_in + layer_norm(sa, n0_g_ref, n0_b_ref)

    # TransformerBlock: cross-attention(V=value, K=key, Q=query) -> LN -> residual
    src_add = smask_ref[0]                 # (1 or tq, Lk) additive, broadcasts over rows
    ca = attention(query, key_ref[0], val_ref[0], src_add,
                   ca_wq_ref, ca_wk_ref, ca_wv_ref, ca_wo_ref, ca_bo_ref)
    xb = query + layer_norm(ca, n1_g_ref, n1_b_ref)

    # Feed-forward: Linear -> ReLU -> Linear, then LN + residual
    h = jnp.dot(xb.astype(bf16), w1_ref[...], preferred_element_type=f32) + b1_ref[...]
    h = jnp.maximum(h, 0.0)
    ff = jnp.dot(h.astype(bf16), w2_ref[...], preferred_element_type=f32) + b2_ref[...]
    out_ref[0] = (xb + layer_norm(ff, n2_g_ref, n2_b_ref)).astype(out_ref.dtype)


# ----------------------------------------------------------------------------
# Wrapper: trace-time weight preprocessing + one pallas_call
# ----------------------------------------------------------------------------

def _bmap_full(b, qi):
    return (b, 0, 0)


def _bmap_qtile(b, qi):
    return (b, qi, 0)


def _smap(*_args, nd):
    return (0,) * nd


def _block_diag_T(w, heads):
    """w: (hd, hd) PyTorch (out, in) layout. Returns (E, E) block-diagonal B such that
    (x @ B)[:, h-block] == x[:, h-block] @ w.T for every head (weight shared across heads)."""
    return jnp.kron(jnp.eye(heads, dtype=w.dtype), w.T)


def _to_additive_mask(mask, n, lk):
    """0/1 mask broadcastable to (N, 1, rq, Lk) -> compact additive f32 (N, rq, Lk)
    (0 where kept, -1e20 where masked). None -> (N, 1, 1) zeros."""
    if mask is None:
        return jnp.zeros((n, 1, 1), jnp.float32)
    m = jnp.asarray(mask, jnp.float32)
    if m.ndim == 4:
        m = m[:, 0]          # drop the (size-1) head dim
    elif m.ndim == 2:
        m = m[None]
    m = jnp.broadcast_to(m, (n, m.shape[1], lk))
    return jnp.where(m != 0.0, 0.0, -1e20).astype(jnp.float32)


def _mask_spec(mask_add, q_tile, num_q_tiles):
    _, rq, cols = mask_add.shape
    if num_q_tiles > 1 and rq > 1:
        return pl.BlockSpec((1, q_tile, cols), _bmap_qtile)
    return pl.BlockSpec((1, rq, cols), _bmap_full)


def decoder_block_forward(params, x, value, key, src_mask, trg_mask, *,
                          heads, trg_is_causal=False, q_block=None):
    n, lq, embed = x.shape
    lk = key.shape[1]
    assert value.shape[1] == lk, "key/value lengths must match"
    assert embed % heads == 0
    hd = embed // heads
    scale = 1.0 / float(np.sqrt(embed))   # softmax(energy / embed_size**0.5)
    eps = 1e-5
    bf16 = jnp.bfloat16

    # ---- query-length tiling (second, parallel grid axis) ----
    if q_block is not None:
        q_tile = q_block
    elif lq <= 128:
        q_tile = lq
    else:
        q_tile = next((t for t in (128, 64, 32, 16, 8) if lq % t == 0), lq)
    assert lq % q_tile == 0
    num_q_tiles = lq // q_tile

    # ---- compact additive masks (no (N, Lq, Lk) f32 materialisation) ----
    src_add = _to_additive_mask(src_mask, n, lk)
    if trg_is_causal:
        trg_add = jnp.zeros((n, 1, 1), jnp.float32)   # unused dummy; causal mask built in-kernel
    else:
        trg_add = _to_additive_mask(trg_mask, n, lq)

    # ---- weights: pre-transposed, block-diagonal QKV, bf16 MXU operands,
    #      softmax scale folded into Wq at trace time ----
    shared = [
        (_block_diag_T(params["sa_wq"], heads) * scale).astype(bf16),
        _block_diag_T(params["sa_wk"], heads).astype(bf16),
        _block_diag_T(params["sa_wv"], heads).astype(bf16),
        params["sa_wo"].T.astype(bf16), params["sa_bo"],
        params["norm0_g"], params["norm0_b"],
        (_block_diag_T(params["ca_wq"], heads) * scale).astype(bf16),
        _block_diag_T(params["ca_wk"], heads).astype(bf16),
        _block_diag_T(params["ca_wv"], heads).astype(bf16),
        params["ca_wo"].T.astype(bf16), params["ca_bo"],
        params["norm1_g"], params["norm1_b"],
        params["ff_w1"].T.astype(bf16), params["ff_b1"],
        params["ff_w2"].T.astype(bf16), params["ff_b2"],
        params["norm2_g"], params["norm2_b"],
    ]
    batched = [x, value, key, src_add, trg_add]

    in_specs = [
        pl.BlockSpec((1, lq, embed), _bmap_full),     # x (full length: self-attn K/V + q slicing)
        pl.BlockSpec((1, lk, embed), _bmap_full),     # value (encoder output)
        pl.BlockSpec((1, lk, embed), _bmap_full),     # key   (encoder output)
        _mask_spec(src_add, q_tile, num_q_tiles),
        _mask_spec(trg_add, q_tile, num_q_tiles),
    ]
    in_specs += [pl.BlockSpec(a.shape, functools.partial(_smap, nd=a.ndim)) for a in shared]
    out_spec = pl.BlockSpec((1, q_tile, embed), _bmap_qtile)

    kernel = functools.partial(
        _decoder_block_kernel, heads=heads, head_dim=hd, q_tile=q_tile,
        num_q_tiles=num_q_tiles, causal_trg=trg_is_causal, eps=eps)

    return pl.pallas_call(
        kernel,
        out_shape=jax.ShapeDtypeStruct((n, lq, embed), jnp.float32),
        grid_spec=pltpu.PrefetchScalarGridSpec(
            num_scalar_prefetch=0,
            grid=(n, num_q_tiles),
            in_specs=in_specs,
            out_specs=out_spec,
            scratch_shapes=[pltpu.VMEM((q_tile, embed), jnp.float32)]),
        compiler_params=pltpu.CompilerParams(
            dimension_semantics=("parallel", "parallel"),
            vmem_limit_bytes=32 * 1024 * 1024),
    )(*batched, *shared)


# ----------------------------------------------------------------------------
# Parameter init (PyTorch-style shapes; LayerNorm eps = 1e-5; dropout = identity)
# ----------------------------------------------------------------------------

def init_params(key, embed, heads, forward_expansion):
    hd = embed // heads
    ks = jax.random.split(key, 14)

    def lin_w(k, out_dim, in_dim):
        bound = 1.0 / np.sqrt(in_dim)
        return jax.random.uniform(k, (out_dim, in_dim), jnp.float32, -bound, bound)

    def lin_b(k, out_dim, in_dim):
        bound = 1.0 / np.sqrt(in_dim)
        return jax.random.uniform(k, (1, out_dim), jnp.float32, -bound, bound)

    fe = forward_expansion * embed
    return {
        # decoder masked self-attention (one (hd,hd) matrix shared across heads)
        "sa_wq": lin_w(ks[0], hd, hd), "sa_wk": lin_w(ks[1], hd, hd),
        "sa_wv": lin_w(ks[2], hd, hd),
        "sa_wo": lin_w(ks[3], embed, embed), "sa_bo": lin_b(ks[4], embed, embed),
        "norm0_g": jnp.ones((1, embed), jnp.float32),
        "norm0_b": jnp.zeros((1, embed), jnp.float32),
        # transformer-block cross-attention
        "ca_wq": lin_w(ks[5], hd, hd), "ca_wk": lin_w(ks[6], hd, hd),
        "ca_wv": lin_w(ks[7], hd, hd),
        "ca_wo": lin_w(ks[8], embed, embed), "ca_bo": lin_b(ks[9], embed, embed),
        "norm1_g": jnp.ones((1, embed), jnp.float32),
        "norm1_b": jnp.zeros((1, embed), jnp.float32),
        # feed-forward
        "ff_w1": lin_w(ks[10], fe, embed), "ff_b1": lin_b(ks[11], fe, embed),
        "ff_w2": lin_w(ks[12], embed, fe), "ff_b2": lin_b(ks[13], embed, fe),
        "norm2_g": jnp.ones((1, embed), jnp.float32),
        "norm2_b": jnp.zeros((1, embed), jnp.float32),
    }


# ----------------------------------------------------------------------------
# Pure-JAX f32 reference mirroring the PyTorch module (for correctness check)
# ----------------------------------------------------------------------------

def _reference_forward(params, x, value, key, src_mask, trg_mask, *, heads):
    embed = x.shape[-1]
    hd = embed // heads
    eps = 1e-5

    def attn(values, keys, queries, mask, wq, wk, wv, wo, bo):
        n, vl = values.shape[0], values.shape[1]
        kl, ql = keys.shape[1], queries.shape[1]
        v = values.reshape(n, vl, heads, hd) @ wv.T
        k = keys.reshape(n, kl, heads, hd) @ wk.T
        q = queries.reshape(n, ql, heads, hd) @ wq.T
        energy = jnp.einsum("nqhd,nkhd->nhqk", q, k)
        if mask is not None:
            energy = jnp.where(mask == 0, -1e20, energy)
        att = jax.nn.softmax(energy / float(np.sqrt(embed)), axis=3)
        out = jnp.einsum("nhqk,nkhd->nqhd", att, v).reshape(n, ql, embed)
        return out @ wo.T + bo

    def ln(z, g, b):
        mu = z.mean(-1, keepdims=True)
        var = ((z - mu) ** 2).mean(-1, keepdims=True)
        return (z - mu) / jnp.sqrt(var + eps) * g + b

    sa = attn(x, x, x, trg_mask, params["sa_wq"], params["sa_wk"], params["sa_wv"],
              params["sa_wo"], params["sa_bo"])
    query = x + ln(sa, params["norm0_g"], params["norm0_b"])
    ca = attn(value, key, query, src_mask, params["ca_wq"], params["ca_wk"],
              params["ca_wv"], params["ca_wo"], params["ca_bo"])
    xb = query + ln(ca, params["norm1_g"], params["norm1_b"])
    h = jnp.maximum(xb @ params["ff_w1"].T + params["ff_b1"], 0.0)
    ff = h @ params["ff_w2"].T + params["ff_b2"]
    return xb + ln(ff, params["norm2_g"], params["norm2_b"])


# ----------------------------------------------------------------------------
if __name__ == "__main__":
    key0 = jax.random.PRNGKey(0)
    k_par, k_x, k_v, k_k = jax.random.split(key0, 4)

    N, L, EMBED, HEADS, FWD_EXP = 2, 8, 32, 4, 2

    params = init_params(k_par, EMBED, HEADS, FWD_EXP)
    x = jax.random.normal(k_x, (N, L, EMBED), jnp.float32)        # decoder input
    value = jax.random.normal(k_v, (N, L, EMBED), jnp.float32)    # encoder output (V)
    enc_key = jax.random.normal(k_k, (N, L, EMBED), jnp.float32)  # encoder output (K)

    # trg_mask: causal (N, 1, L, L);  src_mask: all-ones key-padding (N, 1, 1, L)
    trg_mask = jnp.broadcast_to(jnp.tril(jnp.ones((L, L), jnp.float32))[None, None],
                                (N, 1, L, L))
    src_mask = jnp.ones((N, 1, 1, L), jnp.float32)

    # main path: causal trg mask generated in-kernel (no (N, Lq, Lq) mask DMA)
    y = decoder_block_forward(params, x, value, enc_key, src_mask, trg_mask,
                              heads=HEADS, trg_is_causal=True)
    jax.block_until_ready(y)
    assert y.shape == (N, L, EMBED) and y.dtype == jnp.float32
    assert bool(jnp.all(jnp.isfinite(y)))

    # cross-check: explicit additive trg-mask path agrees with the in-kernel causal mask
    y_explicit = decoder_block_forward(params, x, value, enc_key, src_mask, trg_mask,
                                       heads=HEADS, trg_is_causal=False)
    assert float(jnp.max(jnp.abs(y - y_explicit))) < 1e-4

    # correctness vs pure-JAX f32 reference of the PyTorch module (kernel uses bf16 matmuls)
    y_ref = _reference_forward(params, x, value, enc_key, src_mask, trg_mask, heads=HEADS)
    err = float(jnp.max(jnp.abs(y - y_ref)))
    assert err < 0.2, f"mismatch vs reference: max abs err {err}"

    print("KERNEL_OK")
</pallas_src>

<mosaic_0001>
module attributes {stable_mosaic.version = 11 : i64} {
  func.func @_decoder_block_kernel(%arg0: i32, %arg1: i32, %arg2: memref<1x8x32xf32, #tpu.memory_space<vmem>>, %arg3: memref<1x8x32xf32, #tpu.memory_space<vmem>>, %arg4: memref<1x8x32xf32, #tpu.memory_space<vmem>>, %arg5: memref<1x1x8xf32, #tpu.memory_space<vmem>>, %arg6: memref<1x1x1xf32, #tpu.memory_space<vmem>>, %arg7: memref<32x32xbf16, #tpu.memory_space<vmem>>, %arg8: memref<32x32xbf16, #tpu.memory_space<vmem>>, %arg9: memref<32x32xbf16, #tpu.memory_space<vmem>>, %arg10: memref<32x32xbf16, #tpu.memory_space<vmem>>, %arg11: memref<1x32xf32, #tpu.memory_space<vmem>>, %arg12: memref<1x32xf32, #tpu.memory_space<vmem>>, %arg13: memref<1x32xf32, #tpu.memory_space<vmem>>, %arg14: memref<32x32xbf16, #tpu.memory_space<vmem>>, %arg15: memref<32x32xbf16, #tpu.memory_space<vmem>>, %arg16: memref<32x32xbf16, #tpu.memory_space<vmem>>, %arg17: memref<32x32xbf16, #tpu.memory_space<vmem>>, %arg18: memref<1x32xf32, #tpu.memory_space<vmem>>, %arg19: memref<1x32xf32, #tpu.memory_space<vmem>>, %arg20: memref<1x32xf32, #tpu.memory_space<vmem>>, %arg21: memref<32x64xbf16, #tpu.memory_space<vmem>>, %arg22: memref<1x64xf32, #tpu.memory_space<vmem>>, %arg23: memref<64x32xbf16, #tpu.memory_space<vmem>>, %arg24: memref<1x32xf32, #tpu.memory_space<vmem>>, %arg25: memref<1x32xf32, #tpu.memory_space<vmem>>, %arg26: memref<1x32xf32, #tpu.memory_space<vmem>>, %arg27: memref<1x8x32xf32, #tpu.memory_space<vmem>>, %arg28: memref<8x32xf32, #tpu.memory_space<vmem>>) attributes {dimension_semantics = [#tpu.dimension_semantics<parallel>, #tpu.dimension_semantics<parallel>], iteration_bounds = array<i64: 2, 1>, scalar_prefetch = 0 : i64, scratch_operands = 1 : i64, tpu.core_type = #tpu.core_type<tc>, window_params = [{transform_indices = @transform_0, window_bounds = array<i64: 1, 8, 32>}, {transform_indices = @transform_1, window_bounds = array<i64: 1, 8, 32>}, {transform_indices = @transform_2, window_bounds = array<i64: 1, 8, 32>}, {transform_indices = @transform_3, window_bounds = array<i64: 1, 1, 8>}, {transform_indices = @transform_4, window_bounds = array<i64: 1, 1, 1>}, {pipeline_mode = #tpu.pipeline_mode<synchronous>, transform_indices = @transform_5, window_bounds = array<i64: 32, 32>}, {pipeline_mode = #tpu.pipeline_mode<synchronous>, transform_indices = @transform_6, window_bounds = array<i64: 32, 32>}, {pipeline_mode = #tpu.pipeline_mode<synchronous>, transform_indices = @transform_7, window_bounds = array<i64: 32, 32>}, {pipeline_mode = #tpu.pipeline_mode<synchronous>, transform_indices = @transform_8, window_bounds = array<i64: 32, 32>}, {pipeline_mode = #tpu.pipeline_mode<synchronous>, transform_indices = @transform_9, window_bounds = array<i64: 1, 32>}, {pipeline_mode = #tpu.pipeline_mode<synchronous>, transform_indices = @transform_10, window_bounds = array<i64: 1, 32>}, {pipeline_mode = #tpu.pipeline_mode<synchronous>, transform_indices = @transform_11, window_bounds = array<i64: 1, 32>}, {pipeline_mode = #tpu.pipeline_mode<synchronous>, transform_indices = @transform_12, window_bounds = array<i64: 32, 32>}, {pipeline_mode = #tpu.pipeline_mode<synchronous>, transform_indices = @transform_13, window_bounds = array<i64: 32, 32>}, {pipeline_mode = #tpu.pipeline_mode<synchronous>, transform_indices = @transform_14, window_bounds = array<i64: 32, 32>}, {pipeline_mode = #tpu.pipeline_mode<synchronous>, transform_indices = @transform_15, window_bounds = array<i64: 32, 32>}, {pipeline_mode = #tpu.pipeline_mode<synchronous>, transform_indices = @transform_16, window_bounds = array<i64: 1, 32>}, {pipeline_mode = #tpu.pipeline_mode<synchronous>, transform_indices = @transform_17, window_bounds = array<i64: 1, 32>}, {pipeline_mode = #tpu.pipeline_mode<synchronous>, transform_indices = @transform_18, window_bounds = array<i64: 1, 32>}, {pipeline_mode = #tpu.pipeline_mode<synchronous>, transform_indices = @transform_19, window_bounds = array<i64: 32, 64>}, {pipeline_mode = #tpu.pipeline_mode<synchronous>, transform_indices = @transform_20, window_bounds = array<i64: 1, 64>}, {pipeline_mode = #tpu.pipeline_mode<synchronous>, transform_indices = @transform_21, window_bounds = array<i64: 64, 32>}, {pipeline_mode = #tpu.pipeline_mode<synchronous>, transform_indices = @transform_22, window_bounds = array<i64: 1, 32>}, {pipeline_mode = #tpu.pipeline_mode<synchronous>, transform_indices = @transform_23, window_bounds = array<i64: 1, 32>}, {pipeline_mode = #tpu.pipeline_mode<synchronous>, transform_indices = @transform_24, window_bounds = array<i64: 1, 32>}, {transform_indices = @transform_25, window_bounds = array<i64: 1, 8, 32>}]} {
    %c0 = arith.constant 0 : index
    %c0_0 = arith.constant 0 : index
    %c0_1 = arith.constant 0 : index
    %0 = vector.load %arg2[%c0, %c0_0, %c0_1] : memref<1x8x32xf32, #tpu.memory_space<vmem>>, vector<1x8x32xf32>
    %1 = vector.shape_cast %0 : vector<1x8x32xf32> to vector<8x32xf32>
    %2 = tpu.iota {dimensions = array<i32: 0>} : vector<8x8xi32>
    %c0_i32 = arith.constant 0 : i32
    %3 = vector.broadcast %c0_i32 : i32 to vector<8x8xi32>
    %4 = arith.addi %3, %2 : vector<8x8xi32>
    %5 = tpu.iota {dimensions = array<i32: 1>} : vector<8x8xi32>
    %6 = arith.cmpi sge, %4, %5 : vector<8x8xi32>
    %cst = arith.constant 0.000000e+00 : f32
    %cst_2 = arith.constant -1.000000e+20 : f32
    %7 = vector.broadcast %cst : f32 to vector<8x8xf32>
    %8 = vector.broadcast %cst_2 : f32 to vector<8x8xf32>
    %9 = arith.select %6, %7, %8 : vector<8x8xi1>, vector<8x8xf32>
    %10 = arith.truncf %1 : vector<8x32xf32> to vector<8x32xbf16>
    %11 = arith.truncf %1 : vector<8x32xf32> to vector<8x32xbf16>
    %12 = arith.truncf %1 : vector<8x32xf32> to vector<8x32xbf16>
    %c0_3 = arith.constant 0 : index
    %c0_4 = arith.constant 0 : index
    %13 = vector.load %arg7[%c0_3, %c0_4] : memref<32x32xbf16, #tpu.memory_space<vmem>>, vector<32x32xbf16>
    %cst_5 = arith.constant dense<0.000000e+00> : vector<8x32xf32>
    %14 = tpu.matmul %10, %13, %cst_5 {dimension_numbers = #tpu.dot_dimension_numbers<[1], [0], [0], [1], [0, 0, 1, 1], [], []>} : vector<8x32xbf16>, vector<32x32xbf16>, vector<8x32xf32> -> vector<8x32xf32>
    %15 = arith.truncf %14 : vector<8x32xf32> to vector<8x32xbf16>
    %c0_6 = arith.constant 0 : index
    %c0_7 = arith.constant 0 : index
    %16 = vector.load %arg8[%c0_6, %c0_7] : memref<32x32xbf16, #tpu.memory_space<vmem>>, vector<32x32xbf16>
    %cst_8 = arith.constant dense<0.000000e+00> : vector<8x32xf32>
    %17 = tpu.matmul %11, %16, %cst_8 {dimension_numbers = #tpu.dot_dimension_numbers<[1], [0], [0], [1], [0, 0, 1, 1], [], []>} : vector<8x32xbf16>, vector<32x32xbf16>, vector<8x32xf32> -> vector<8x32xf32>
    %18 = arith.truncf %17 : vector<8x32xf32> to vector<8x32xbf16>
    %c0_9 = arith.constant 0 : index
    %c0_10 = arith.constant 0 : index
    %19 = vector.load %arg9[%c0_9, %c0_10] : memref<32x32xbf16, #tpu.memory_space<vmem>>, vector<32x32xbf16>
    %cst_11 = arith.constant dense<0.000000e+00> : vector<8x32xf32>
    %20 = tpu.matmul %12, %19, %cst_11 {dimension_numbers = #tpu.dot_dimension_numbers<[1], [0], [0], [1], [0, 0, 1, 1], [], []>} : vector<8x32xbf16>, vector<32x32xbf16>, vector<8x32xf32> -> vector<8x32xf32>
    %21 = arith.truncf %20 : vector<8x32xf32> to vector<8x32xbf16>
    %22 = vector.extract_strided_slice %15 {offsets = [0, 0], sizes = [8, 8], strides = [1, 1]} : vector<8x32xbf16> to vector<8x8xbf16>
    %23 = vector.extract_strided_slice %18 {offsets = [0, 0], sizes = [8, 8], strides = [1, 1]} : vector<8x32xbf16> to vector<8x8xbf16>
    %cst_12 = arith.constant dense<0.000000e+00> : vector<8x8xf32>
    %24 = tpu.matmul %22, %23, %cst_12 {dimension_numbers = #tpu.dot_dimension_numbers<[1], [1], [0], [0], [0, 0, 1, 0], [], []>} : vector<8x8xbf16>, vector<8x8xbf16>, vector<8x8xf32> -> vector<8x8xf32>
    %25 = arith.addf %24, %9 : vector<8x8xf32>
    %cst_13 = arith.constant dense<0xFF800000> : vector<8xf32>
    %26 = vector.multi_reduction <maximumf>, %25, %cst_13 [1] : vector<8x8xf32> to vector<8xf32>
    %27 = vector.shape_cast %26 : vector<8xf32> to vector<8x1xf32>
    %28 = vector.broadcast %27 : vector<8x1xf32> to vector<8x8xf32>
    %29 = arith.subf %25, %28 : vector<8x8xf32>
    %30 = math.exp %29 : vector<8x8xf32>
    %cst_14 = arith.constant dense<0.000000e+00> : vector<8xf32>
    %31 = vector.multi_reduction <add>, %30, %cst_14 [1] : vector<8x8xf32> to vector<8xf32>
    %32 = vector.shape_cast %31 : vector<8xf32> to vector<8x1xf32>
    %33 = tpu.reciprocal %32 {approx = true} : vector<8x1xf32> -> vector<8x1xf32>
    %34 = vector.broadcast %33 : vector<8x1xf32> to vector<8x8xf32>
    %35 = arith.mulf %30, %34 : vector<8x8xf32>
    %36 = arith.truncf %35 : vector<8x8xf32> to vector<8x8xbf16>
    %37 = vector.extract_strided_slice %21 {offsets = [0, 0], sizes = [8, 8], strides = [1, 1]} : vector<8x32xbf16> to vector<8x8xbf16>
    %cst_15 = arith.constant dense<0.000000e+00> : vector<8x8xf32>
    %38 = tpu.matmul %36, %37, %cst_15 {dimension_numbers = #tpu.dot_dimension_numbers<[1], [0], [0], [1], [0, 0, 1, 1], [], []>} : vector<8x8xbf16>, vector<8x8xbf16>, vector<8x8xf32> -> vector<8x8xf32>
    %c0_16 = arith.constant 0 : index
    %c0_17 = arith.constant 0 : index
    %39 = vector.load %arg28[%c0_16, %c0_17] : memref<8x32xf32, #tpu.memory_space<vmem>>, vector<8x8xf32>
    tpu.vector_store %arg28[%c0_16, %c0_17], %38 {strides = array<i32>} : memref<8x32xf32, #tpu.memory_space<vmem>>, vector<8x8xf32>,
    %40 = vector.extract_strided_slice %15 {offsets = [0, 8], sizes = [8, 8], strides = [1, 1]} : vector<8x32xbf16> to vector<8x8xbf16>
    %41 = vector.extract_strided_slice %18 {offsets = [0, 8], sizes = [8, 8], strides = [1, 1]} : vector<8x32xbf16> to vector<8x8xbf16>
    %cst_18 = arith.constant dense<0.000000e+00> : vector<8x8xf32>
    %42 = tpu.matmul %40, %41, %cst_18 {dimension_numbers = #tpu.dot_dimension_numbers<[1], [1], [0], [0], [0, 0, 1, 0], [], []>} : vector<8x8xbf16>, vector<8x8xbf16>, vector<8x8xf32> -> vector<8x8xf32>
    %43 = arith.addf %42, %9 : vector<8x8xf32>
    %cst_19 = arith.constant dense<0xFF800000> : vector<8xf32>
    %44 = vector.multi_reduction <maximumf>, %43, %cst_19 [1] : vector<8x8xf32> to vector<8xf32>
    %45 = vector.shape_cast %44 : vector<8xf32> to vector<8x1xf32>
    %46 = vector.broadcast %45 : vector<8x1xf32> to vector<8x8xf32>
    %47 = arith.subf %43, %46 : vector<8x8xf32>
    %48 = math.exp %47 : vector<8x8xf32>
    %cst_20 = arith.constant dense<0.000000e+00> : vector<8xf32>
    %49 = vector.multi_reduction <add>, %48, %cst_20 [1] : vector<8x8xf32> to vector<8xf32>
    %50 = vector.shape_cast %49 : vector<8xf32> to vector<8x1xf32>
    %51 = tpu.reciprocal %50 {approx = true} : vector<8x1xf32> -> vector<8x1xf32>
    %52 = vector.broadcast %51 : vector<8x1xf32> to vector<8x8xf32>
    %53 = arith.mulf %48, %52 : vector<8x8xf32>
    %54 = arith.truncf %53 : vector<8x8xf32> to vector<8x8xbf16>
    %55 = vector.extract_strided_slice %21 {offsets = [0, 8], sizes = [8, 8], strides = [1, 1]} : vector<8x32xbf16> to vector<8x8xbf16>
    %cst_21 = arith.constant dense<0.000000e+00> : vector<8x8xf32>
    %56 = tpu.matmul %54, %55, %cst_21 {dimension_numbers = #tpu.dot_dimension_numbers<[1], [0], [0], [1], [0, 0, 1, 1], [], []>} : vector<8x8xbf16>, vector<8x8xbf16>, vector<8x8xf32> -> vector<8x8xf32>
    %c0_22 = arith.constant 0 : index
    %c8 = arith.constant 8 : index
    %57 = vector.load %arg28[%c0_22, %c8] : memref<8x32xf32, #tpu.memory_space<vmem>>, vector<8x8xf32>
    tpu.vector_store %arg28[%c0_22, %c8], %56 {strides = array<i32>} : memref<8x32xf32, #tpu.memory_space<vmem>>, vector<8x8xf32>,
    %58 = vector.extract_strided_slice %15 {offsets = [0, 16], sizes = [8, 8], strides = [1, 1]} : vector<8x32xbf16> to vector<8x8xbf16>
    %59 = vector.extract_strided_slice %18 {offsets = [0, 16], sizes = [8, 8], strides = [1, 1]} : vector<8x32xbf16> to vector<8x8xbf16>
    %cst_23 = arith.constant dense<0.000000e+00> : vector<8x8xf32>
    %60 = tpu.matmul %58, %59, %cst_23 {dimension_numbers = #tpu.dot_dimension_numbers<[1], [1], [0], [0], [0, 0, 1, 0], [], []>} : vector<8x8xbf16>, vector<8x8xbf16>, vector<8x8xf32> -> vector<8x8xf32>
    %61 = arith.addf %60, %9 : vector<8x8xf32>
    %cst_24 = arith.constant dense<0xFF800000> : vector<8xf32>
    %62 = vector.multi_reduction <maximumf>, %61, %cst_24 [1] : vector<8x8xf32> to vector<8xf32>
    %63 = vector.shape_cast %62 : vector<8xf32> to vector<8x1xf32>
    %64 = vector.broadcast %63 : vector<8x1xf32> to vector<8x8xf32>
    %65 = arith.subf %61, %64 : vector<8x8xf32>
    %66 = math.exp %65 : vector<8x8xf32>
    %cst_25 = arith.constant dense<0.000000e+00> : vector<8xf32>
    %67 = vector.multi_reduction <add>, %66, %cst_25 [1] : vector<8x8xf32> to vector<8xf32>
    %68 = vector.shape_cast %67 : vector<8xf32> to vector<8x1xf32>
    %69 = tpu.reciprocal %68 {approx = true} : vector<8x1xf32> -> vector<8x1xf32>
    %70 = vector.broadcast %69 : vector<8x1xf32> to vector<8x8xf32>
    %71 = arith.mulf %66, %70 : vector<8x8xf32>
    %72 = arith.truncf %71 : vector<8x8xf32> to vector<8x8xbf16>
    %73 = vector.extract_strided_slice %21 {offsets = [0, 16], sizes = [8, 8], strides = [1, 1]} : vector<8x32xbf16> to vector<8x8xbf16>
    %cst_26 = arith.constant dense<0.000000e+00> : vector<8x8xf32>
    %74 = tpu.matmul %72, %73, %cst_26 {dimension_numbers = #tpu.dot_dimension_numbers<[1], [0], [0], [1], [0, 0, 1, 1], [], []>} : vector<8x8xbf16>, vector<8x8xbf16>, vector<8x8xf32> -> vector<8x8xf32>
    %c0_27 = arith.constant 0 : index
    %c16 = arith.constant 16 : index
    %75 = vector.load %arg28[%c0_27, %c16] : memref<8x32xf32, #tpu.memory_space<vmem>>, vector<8x8xf32>
    tpu.vector_store %arg28[%c0_27, %c16], %74 {strides = array<i32>} : memref<8x32xf32, #tpu.memory_space<vmem>>, vector<8x8xf32>,
    %76 = vector.extract_strided_slice %15 {offsets = [0, 24], sizes = [8, 8], strides = [1, 1]} : vector<8x32xbf16> to vector<8x8xbf16>
    %77 = vector.extract_strided_slice %18 {offsets = [0, 24], sizes = [8, 8], strides = [1, 1]} : vector<8x32xbf16> to vector<8x8xbf16>
    %cst_28 = arith.constant dense<0.000000e+00> : vector<8x8xf32>
    %78 = tpu.matmul %76, %77, %cst_28 {dimension_numbers = #tpu.dot_dimension_numbers<[1], [1], [0], [0], [0, 0, 1, 0], [], []>} : vector<8x8xbf16>, vector<8x8xbf16>, vector<8x8xf32> -> vector<8x8xf32>
    %79 = arith.addf %78, %9 : vector<8x8xf32>
    %cst_29 = arith.constant dense<0xFF800000> : vector<8xf32>
    %80 = vector.multi_reduction <maximumf>, %79, %cst_29 [1] : vector<8x8xf32> to vector<8xf32>
    %81 = vector.shape_cast %80 : vector<8xf32> to vector<8x1xf32>
    %82 = vector.broadcast %81 : vector<8x1xf32> to vector<8x8xf32>
    %83 = arith.subf %79, %82 : vector<8x8xf32>
    %84 = math.exp %83 : vector<8x8xf32>
    %cst_30 = arith.constant dense<0.000000e+00> : vector<8xf32>
    %85 = vector.multi_reduction <add>, %84, %cst_30 [1] : vector<8x8xf32> to vector<8xf32>
    %86 = vector.shape_cast %85 : vector<8xf32> to vector<8x1xf32>
    %87 = tpu.reciprocal %86 {approx = true} : vector<8x1xf32> -> vector<8x1xf32>
    %88 = vector.broadcast %87 : vector<8x1xf32> to vector<8x8xf32>
    %89 = arith.mulf %84, %88 : vector<8x8xf32>
    %90 = arith.truncf %89 : vector<8x8xf32> to vector<8x8xbf16>
    %91 = vector.extract_strided_slice %21 {offsets = [0, 24], sizes = [8, 8], strides = [1, 1]} : vector<8x32xbf16> to vector<8x8xbf16>
    %cst_31 = arith.constant dense<0.000000e+00> : vector<8x8xf32>
    %92 = tpu.matmul %90, %91, %cst_31 {dimension_numbers = #tpu.dot_dimension_numbers<[1], [0], [0], [1], [0, 0, 1, 1], [], []>} : vector<8x8xbf16>, vector<8x8xbf16>, vector<8x8xf32> -> vector<8x8xf32>
    %c0_32 = arith.constant 0 : index
    %c24 = arith.constant 24 : index
    %93 = vector.load %arg28[%c0_32, %c24] : memref<8x32xf32, #tpu.memory_space<vmem>>, vector<8x8xf32>
    tpu.vector_store %arg28[%c0_32, %c24], %92 {strides = array<i32>} : memref<8x32xf32, #tpu.memory_space<vmem>>, vector<8x8xf32>,
    %c0_33 = arith.constant 0 : index
    %c0_34 = arith.constant 0 : index
    %94 = vector.load %arg28[%c0_33, %c0_34] : memref<8x32xf32, #tpu.memory_space<vmem>>, vector<8x32xf32>
    %95 = arith.truncf %94 : vector<8x32xf32> to vector<8x32xbf16>
    %c0_35 = arith.constant 0 : index
    %c0_36 = arith.constant 0 : index
    %96 = vector.load %arg10[%c0_35, %c0_36] : memref<32x32xbf16, #tpu.memory_space<vmem>>, vector<32x32xbf16>
    %cst_37 = arith.constant dense<0.000000e+00> : vector<8x32xf32>
    %97 = tpu.matmul %95, %96, %cst_37 {dimension_numbers = #tpu.dot_dimension_numbers<[1], [0], [0], [1], [0, 0, 1, 1], [], []>} : vector<8x32xbf16>, vector<32x32xbf16>, vector<8x32xf32> -> vector<8x32xf32>
    %c0_38 = arith.constant 0 : index
    %c0_39 = arith.constant 0 : index
    %98 = vector.load %arg11[%c0_38, %c0_39] : memref<1x32xf32, #tpu.memory_space<vmem>>, vector<1x32xf32>
    %99 = vector.broadcast %98 : vector<1x32xf32> to vector<8x32xf32>
    %100 = arith.addf %97, %99 : vector<8x32xf32>
    %cst_40 = arith.constant dense<0.000000e+00> : vector<8xf32>
    %101 = vector.multi_reduction <add>, %100, %cst_40 [1] : vector<8x32xf32> to vector<8xf32>
    %102 = vector.shape_cast %101 : vector<8xf32> to vector<8x1xf32>
    %cst_41 = arith.constant 3.200000e+01 : f32
    %103 = vector.broadcast %cst_41 : f32 to vector<8x1xf32>
    %104 = arith.divf %102, %103 : vector<8x1xf32>
    %105 = vector.broadcast %104 : vector<8x1xf32> to vector<8x32xf32>
    %106 = arith.subf %100, %105 : vector<8x32xf32>
    %107 = arith.mulf %106, %106 : vector<8x32xf32>
    %cst_42 = arith.constant dense<0.000000e+00> : vector<8xf32>
    %108 = vector.multi_reduction <add>, %107, %cst_42 [1] : vector<8x32xf32> to vector<8xf32>
    %109 = vector.shape_cast %108 : vector<8xf32> to vector<8x1xf32>
    %cst_43 = arith.constant 3.200000e+01 : f32
    %110 = vector.broadcast %cst_43 : f32 to vector<8x1xf32>
    %111 = arith.divf %109, %110 : vector<8x1xf32>
    %cst_44 = arith.constant 9.99999974E-6 : f32
    %112 = vector.broadcast %cst_44 : f32 to vector<8x1xf32>
    %113 = arith.addf %111, %112 : vector<8x1xf32>
    %114 = math.rsqrt %113 : vector<8x1xf32>
    %115 = vector.broadcast %114 : vector<8x1xf32> to vector<8x32xf32>
    %116 = arith.mulf %106, %115 : vector<8x32xf32>
    %c0_45 = arith.constant 0 : index
    %c0_46 = arith.constant 0 : index
    %117 = vector.load %arg12[%c0_45, %c0_46] : memref<1x32xf32, #tpu.memory_space<vmem>>, vector<1x32xf32>
    %118 = vector.broadcast %117 : vector<1x32xf32> to vector<8x32xf32>
    %119 = arith.mulf %116, %118 : vector<8x32xf32>
    %c0_47 = arith.constant 0 : index
    %c0_48 = arith.constant 0 : index
    %120 = vector.load %arg13[%c0_47, %c0_48] : memref<1x32xf32, #tpu.memory_space<vmem>>, vector<1x32xf32>
    %121 = vector.broadcast %120 : vector<1x32xf32> to vector<8x32xf32>
    %122 = arith.addf %119, %121 : vector<8x32xf32>
    %123 = arith.addf %1, %122 : vector<8x32xf32>
    %c0_49 = arith.constant 0 : index
    %c0_50 = arith.constant 0 : index
    %c0_51 = arith.constant 0 : index
    %124 = vector.load %arg5[%c0_49, %c0_50, %c0_51] : memref<1x1x8xf32, #tpu.memory_space<vmem>>, vector<1x1x8xf32>
    %125 = vector.shape_cast %124 : vector<1x1x8xf32> to vector<1x8xf32>
    %c0_52 = arith.constant 0 : index
    %c0_53 = arith.constant 0 : index
    %c0_54 = arith.constant 0 : index
    %126 = vector.load %arg4[%c0_52, %c0_53, %c0_54] : memref<1x8x32xf32, #tpu.memory_space<vmem>>, vector<1x8x32xf32>
    %127 = vector.shape_cast %126 : vector<1x8x32xf32> to vector<8x32xf32>
    %c0_55 = arith.constant 0 : index
    %c0_56 = arith.constant 0 : index
    %c0_57 = arith.constant 0 : index
    %128 = vector.load %arg3[%c0_55, %c0_56, %c0_57] : memref<1x8x32xf32, #tpu.memory_space<vmem>>, vector<1x8x32xf32>
    %129 = vector.shape_cast %128 : vector<1x8x32xf32> to vector<8x32xf32>
    %130 = arith.truncf %123 : vector<8x32xf32> to vector<8x32xbf16>
    %131 = arith.truncf %127 : vector<8x32xf32> to vector<8x32xbf16>
    %132 = arith.truncf %129 : vector<8x32xf32> to vector<8x32xbf16>
    %c0_58 = arith.constant 0 : index
    %c0_59 = arith.constant 0 : index
    %133 = vector.load %arg14[%c0_58, %c0_59] : memref<32x32xbf16, #tpu.memory_space<vmem>>, vector<32x32xbf16>
    %cst_60 = arith.constant dense<0.000000e+00> : vector<8x32xf32>
    %134 = tpu.matmul %130, %133, %cst_60 {dimension_numbers = #tpu.dot_dimension_numbers<[1], [0], [0], [1], [0, 0, 1, 1], [], []>} : vector<8x32xbf16>, vector<32x32xbf16>, vector<8x32xf32> -> vector<8x32xf32>
    %135 = arith.truncf %134 : vector<8x32xf32> to vector<8x32xbf16>
    %c0_61 = arith.constant 0 : index
    %c0_62 = arith.constant 0 : index
    %136 = vector.load %arg15[%c0_61, %c0_62] : memref<32x32xbf16, #tpu.memory_space<vmem>>, vector<32x32xbf16>
    %cst_63 = arith.constant dense<0.000000e+00> : vector<8x32xf32>
    %137 = tpu.matmul %131, %136, %cst_63 {dimension_numbers = #tpu.dot_dimension_numbers<[1], [0], [0], [1], [0, 0, 1, 1], [], []>} : vector<8x32xbf16>, vector<32x32xbf16>, vector<8x32xf32> -> vector<8x32xf32>
    %138 = arith.truncf %137 : vector<8x32xf32> to vector<8x32xbf16>
    %c0_64 = arith.constant 0 : index
    %c0_65 = arith.constant 0 : index
    %139 = vector.load %arg16[%c0_64, %c0_65] : memref<32x32xbf16, #tpu.memory_space<vmem>>, vector<32x32xbf16>
    %cst_66 = arith.constant dense<0.000000e+00> : vector<8x32xf32>
    %140 = tpu.matmul %132, %139, %cst_66 {dimension_numbers = #tpu.dot_dimension_numbers<[1], [0], [0], [1], [0, 0, 1, 1], [], []>} : vector<8x32xbf16>, vector<32x32xbf16>, vector<8x32xf32> -> vector<8x32xf32>
    %141 = arith.truncf %140 : vector<8x32xf32> to vector<8x32xbf16>
    %142 = vector.extract_strided_slice %135 {offsets = [0, 0], sizes = [8, 8], strides = [1, 1]} : vector<8x32xbf16> to vector<8x8xbf16>
    %143 = vector.extract_strided_slice %138 {offsets = [0, 0], sizes = [8, 8], strides = [1, 1]} : vector<8x32xbf16> to vector<8x8xbf16>
    %cst_67 = arith.constant dense<0.000000e+00> : vector<8x8xf32>
    %144 = tpu.matmul %142, %143, %cst_67 {dimension_numbers = #tpu.dot_dimension_numbers<[1], [1], [0], [0], [0, 0, 1, 0], [], []>} : vector<8x8xbf16>, vector<8x8xbf16>, vector<8x8xf32> -> vector<8x8xf32>
    %145 = vector.broadcast %125 : vector<1x8xf32> to vector<8x8xf32>
    %146 = arith.addf %144, %145 : vector<8x8xf32>
    %cst_68 = arith.constant dense<0xFF800000> : vector<8xf32>
    %147 = vector.multi_reduction <maximumf>, %146, %cst_68 [1] : vector<8x8xf32> to vector<8xf32>
    %148 = vector.shape_cast %147 : vector<8xf32> to vector<8x1xf32>
    %149 = vector.broadcast %148 : vector<8x1xf32> to vector<8x8xf32>
    %150 = arith.subf %146, %149 : vector<8x8xf32>
    %151 = math.exp %150 : vector<8x8xf32>
    %cst_69 = arith.constant dense<0.000000e+00> : vector<8xf32>
    %152 = vector.multi_reduction <add>, %151, %cst_69 [1] : vector<8x8xf32> to vector<8xf32>
    %153 = vector.shape_cast %152 : vector<8xf32> to vector<8x1xf32>
    %154 = tpu.reciprocal %153 {approx = true} : vector<8x1xf32> -> vector<8x1xf32>
    %155 = vector.broadcast %154 : vector<8x1xf32> to vector<8x8xf32>
    %156 = arith.mulf %151, %155 : vector<8x8xf32>
    %157 = arith.truncf %156 : vector<8x8xf32> to vector<8x8xbf16>
    %158 = vector.extract_strided_slice %141 {offsets = [0, 0], sizes = [8, 8], strides = [1, 1]} : vector<8x32xbf16> to vector<8x8xbf16>
    %cst_70 = arith.constant dense<0.000000e+00> : vector<8x8xf32>
    %159 = tpu.matmul %157, %158, %cst_70 {dimension_numbers = #tpu.dot_dimension_numbers<[1], [0], [0], [1], [0, 0, 1, 1], [], []>} : vector<8x8xbf16>, vector<8x8xbf16>, vector<8x8xf32> -> vector<8x8xf32>
    %c0_71 = arith.constant 0 : index
    %c0_72 = arith.constant 0 : index
    %160 = vector.load %arg28[%c0_71, %c0_72] : memref<8x32xf32, #tpu.memory_space<vmem>>, vector<8x8xf32>
    tpu.vector_store %arg28[%c0_71, %c0_72], %159 {strides = array<i32>} : memref<8x32xf32, #tpu.memory_space<vmem>>, vector<8x8xf32>,
    %161 = vector.extract_strided_slice %135 {offsets = [0, 8], sizes = [8, 8], strides = [1, 1]} : vector<8x32xbf16> to vector<8x8xbf16>
    %162 = vector.extract_strided_slice %138 {offsets = [0, 8], sizes = [8, 8], strides = [1, 1]} : vector<8x32xbf16> to vector<8x8xbf16>
    %cst_73 = arith.constant dense<0.000000e+00> : vector<8x8xf32>
    %163 = tpu.matmul %161, %162, %cst_73 {dimension_numbers = #tpu.dot_dimension_numbers<[1], [1], [0], [0], [0, 0, 1, 0], [], []>} : vector<8x8xbf16>, vector<8x8xbf16>, vector<8x8xf32> -> vector<8x8xf32>
    %164 = vector.broadcast %125 : vector<1x8xf32> to vector<8x8xf32>
    %165 = arith.addf %163, %164 : vector<8x8xf32>
    %cst_74 = arith.constant dense<0xFF800000> : vector<8xf32>
    %166 = vector.multi_reduction <maximumf>, %165, %cst_74 [1] : vector<8x8xf32> to vector<8xf32>
    %167 = vector.shape_cast %166 : vector<8xf32> to vector<8x1xf32>
    %168 = vector.broadcast %167 : vector<8x1xf32> to vector<8x8xf32>
    %169 = arith.subf %165, %168 : vector<8x8xf32>
    %170 = math.exp %169 : vector<8x8xf32>
    %cst_75 = arith.constant dense<0.000000e+00> : vector<8xf32>
    %171 = vector.multi_reduction <add>, %170, %cst_75 [1] : vector<8x8xf32> to vector<8xf32>
    %172 = vector.shape_cast %171 : vector<8xf32> to vector<8x1xf32>
    %173 = tpu.reciprocal %172 {approx = true} : vector<8x1xf32> -> vector<8x1xf32>
    %174 = vector.broadcast %173 : vector<8x1xf32> to vector<8x8xf32>
    %175 = arith.mulf %170, %174 : vector<8x8xf32>
    %176 = arith.truncf %175 : vector<8x8xf32> to vector<8x8xbf16>
    %177 = vector.extract_strided_slice %141 {offsets = [0, 8], sizes = [8, 8], strides = [1, 1]} : vector<8x32xbf16> to vector<8x8xbf16>
    %cst_76 = arith.constant dense<0.000000e+00> : vector<8x8xf32>
    %178 = tpu.matmul %176, %177, %cst_76 {dimension_numbers = #tpu.dot_dimension_numbers<[1], [0], [0], [1], [0, 0, 1, 1], [], []>} : vector<8x8xbf16>, vector<8x8xbf16>, vector<8x8xf32> -> vector<8x8xf32>
    %c0_77 = arith.constant 0 : index
    %c8_78 = arith.constant 8 : index
    %179 = vector.load %arg28[%c0_77, %c8_78] : memref<8x32xf32, #tpu.memory_space<vmem>>, vector<8x8xf32>
    tpu.vector_store %arg28[%c0_77, %c8_78], %178 {strides = array<i32>} : memref<8x32xf32, #tpu.memory_space<vmem>>, vector<8x8xf32>,
    %180 = vector.extract_strided_slice %135 {offsets = [0, 16], sizes = [8, 8], strides = [1, 1]} : vector<8x32xbf16> to vector<8x8xbf16>
    %181 = vector.extract_strided_slice %138 {offsets = [0, 16], sizes = [8, 8], strides = [1, 1]} : vector<8x32xbf16> to vector<8x8xbf16>
    %cst_79 = arith.constant dense<0.000000e+00> : vector<8x8xf32>
    %182 = tpu.matmul %180, %181, %cst_79 {dimension_numbers = #tpu.dot_dimension_numbers<[1], [1], [0], [0], [0, 0, 1, 0], [], []>} : vector<8x8xbf16>, vector<8x8xbf16>, vector<8x8xf32> -> vector<8x8xf32>
    %183 = vector.broadcast %125 : vector<1x8xf32> to vector<8x8xf32>
    %184 = arith.addf %182, %183 : vector<8x8xf32>
    %cst_80 = arith.constant dense<0xFF800000> : vector<8xf32>
    %185 = vector.multi_reduction <maximumf>, %184, %cst_80 [1] : vector<8x8xf32> to vector<8xf32>
    %186 = vector.shape_cast %185 : vector<8xf32> to vector<8x1xf32>
    %187 = vector.broadcast %186 : vector<8x1xf32> to vector<8x8xf32>
    %188 = arith.subf %184, %187 : vector<8x8xf32>
    %189 = math.exp %188 : vector<8x8xf32>
    %cst_81 = arith.constant dense<0.000000e+00> : vector<8xf32>
    %190 = vector.multi_reduction <add>, %189, %cst_81 [1] : vector<8x8xf32> to vector<8xf32>
    %191 = vector.shape_cast %190 : vector<8xf32> to vector<8x1xf32>
    %192 = tpu.reciprocal %191 {approx = true} : vector<8x1xf32> -> vector<8x1xf32>
    %193 = vector.broadcast %192 : vector<8x1xf32> to vector<8x8xf32>
    %194 = arith.mulf %189, %193 : vector<8x8xf32>
    %195 = arith.truncf %194 : vector<8x8xf32> to vector<8x8xbf16>
    %196 = vector.extract_strided_slice %141 {offsets = [0, 16], sizes = [8, 8], strides = [1, 1]} : vector<8x32xbf16> to vector<8x8xbf16>
    %cst_82 = arith.constant dense<0.000000e+00> : vector<8x8xf32>
    %197 = tpu.matmul %195, %196, %cst_82 {dimension_numbers = #tpu.dot_dimension_numbers<[1], [0], [0], [1], [0, 0, 1, 1], [], []>} : vector<8x8xbf16>, vector<8x8xbf16>, vector<8x8xf32> -> vector<8x8xf32>
    %c0_83 = arith.constant 0 : index
    %c16_84 = arith.constant 16 : index
    %198 = vector.load %arg28[%c0_83, %c16_84] : memref<8x32xf32, #tpu.memory_space<vmem>>, vector<8x8xf32>
    tpu.vector_store %arg28[%c0_83, %c16_84], %197 {strides = array<i32>} : memref<8x32xf32, #tpu.memory_space<vmem>>, vector<8x8xf32>,
    %199 = vector.extract_strided_slice %135 {offsets = [0, 24], sizes = [8, 8], strides = [1, 1]} : vector<8x32xbf16> to vector<8x8xbf16>
    %200 = vector.extract_strided_slice %138 {offsets = [0, 24], sizes = [8, 8], strides = [1, 1]} : vector<8x32xbf16> to vector<8x8xbf16>
    %cst_85 = arith.constant dense<0.000000e+00> : vector<8x8xf32>
    %201 = tpu.matmul %199, %200, %cst_85 {dimension_numbers = #tpu.dot_dimension_numbers<[1], [1], [0], [0], [0, 0, 1, 0], [], []>} : vector<8x8xbf16>, vector<8x8xbf16>, vector<8x8xf32> -> vector<8x8xf32>
    %202 = vector.broadcast %125 : vector<1x8xf32> to vector<8x8xf32>
    %203 = arith.addf %201, %202 : vector<8x8xf32>
    %cst_86 = arith.constant dense<0xFF800000> : vector<8xf32>
    %204 = vector.multi_reduction <maximumf>, %203, %cst_86 [1] : vector<8x8xf32> to vector<8xf32>
    %205 = vector.shape_cast %204 : vector<8xf32> to vector<8x1xf32>
    %206 = vector.broadcast %205 : vector<8x1xf32> to vector<8x8xf32>
    %207 = arith.subf %203, %206 : vector<8x8xf32>
    %208 = math.exp %207 : vector<8x8xf32>
    %cst_87 = arith.constant dense<0.000000e+00> : vector<8xf32>
    %209 = vector.multi_reduction <add>, %208, %cst_87 [1] : vector<8x8xf32> to vector<8xf32>
    %210 = vector.shape_cast %209 : vector<8xf32> to vector<8x1xf32>
    %211 = tpu.reciprocal %210 {approx = true} : vector<8x1xf32> -> vector<8x1xf32>
    %212 = vector.broadcast %211 : vector<8x1xf32> to vector<8x8xf32>
    %213 = arith.mulf %208, %212 : vector<8x8xf32>
    %214 = arith.truncf %213 : vector<8x8xf32> to vector<8x8xbf16>
    %215 = vector.extract_strided_slice %141 {offsets = [0, 24], sizes = [8, 8], strides = [1, 1]} : vector<8x32xbf16> to vector<8x8xbf16>
    %cst_88 = arith.constant dense<0.000000e+00> : vector<8x8xf32>
    %216 = tpu.matmul %214, %215, %cst_88 {dimension_numbers = #tpu.dot_dimension_numbers<[1], [0], [0], [1], [0, 0, 1, 1], [], []>} : vector<8x8xbf16>, vector<8x8xbf16>, vector<8x8xf32> -> vector<8x8xf32>
    %c0_89 = arith.constant 0 : index
    %c24_90 = arith.constant 24 : index
    %217 = vector.load %arg28[%c0_89, %c24_90] : memref<8x32xf32, #tpu.memory_space<vmem>>, vector<8x8xf32>
    tpu.vector_store %arg28[%c0_89, %c24_90], %216 {strides = array<i32>} : memref<8x32xf32, #tpu.memory_space<vmem>>, vector<8x8xf32>,
    %c0_91 = arith.constant 0 : index
    %c0_92 = arith.constant 0 : index
    %218 = vector.load %arg28[%c0_91, %c0_92] : memref<8x32xf32, #tpu.memory_space<vmem>>, vector<8x32xf32>
    %219 = arith.truncf %218 : vector<8x32xf32> to vector<8x32xbf16>
    %c0_93 = arith.constant 0 : index
    %c0_94 = arith.constant 0 : index
    %220 = vector.load %arg17[%c0_93, %c0_94] : memref<32x32xbf16, #tpu.memory_space<vmem>>, vector<32x32xbf16>
    %cst_95 = arith.constant dense<0.000000e+00> : vector<8x32xf32>
    %221 = tpu.matmul %219, %220, %cst_95 {dimension_numbers = #tpu.dot_dimension_numbers<[1], [0], [0], [1], [0, 0, 1, 1], [], []>} : vector<8x32xbf16>, vector<32x32xbf16>, vector<8x32xf32> -> vector<8x32xf32>
    %c0_96 = arith.constant 0 : index
    %c0_97 = arith.constant 0 : index
    %222 = vector.load %arg18[%c0_96, %c0_97] : memref<1x32xf32, #tpu.memory_space<vmem>>, vector<1x32xf32>
    %223 = vector.broadcast %222 : vector<1x32xf32> to vector<8x32xf32>
    %224 = arith.addf %221, %223 : vector<8x32xf32>
    %cst_98 = arith.constant dense<0.000000e+00> : vector<8xf32>
    %225 = vector.multi_reduction <add>, %224, %cst_98 [1] : vector<8x32xf32> to vector<8xf32>
    %226 = vector.shape_cast %225 : vector<8xf32> to vector<8x1xf32>
    %cst_99 = arith.constant 3.200000e+01 : f32
    %227 = vector.broadcast %cst_99 : f32 to vector<8x1xf32>
    %228 = arith.divf %226, %227 : vector<8x1xf32>
    %229 = vector.broadcast %228 : vector<8x1xf32> to vector<8x32xf32>
    %230 = arith.subf %224, %229 : vector<8x32xf32>
    %231 = arith.mulf %230, %230 : vector<8x32xf32>
    %cst_100 = arith.constant dense<0.000000e+00> : vector<8xf32>
    %232 = vector.multi_reduction <add>, %231, %cst_100 [1] : vector<8x32xf32> to vector<8xf32>
    %233 = vector.shape_cast %232 : vector<8xf32> to vector<8x1xf32>
    %cst_101 = arith.constant 3.200000e+01 : f32
    %234 = vector.broadcast %cst_101 : f32 to vector<8x1xf32>
    %235 = arith.divf %233, %234 : vector<8x1xf32>
    %cst_102 = arith.constant 9.99999974E-6 : f32
    %236 = vector.broadcast %cst_102 : f32 to vector<8x1xf32>
    %237 = arith.addf %235, %236 : vector<8x1xf32>
    %238 = math.rsqrt %237 : vector<8x1xf32>
    %239 = vector.broadcast %238 : vector<8x1xf32> to vector<8x32xf32>
    %240 = arith.mulf %230, %239 : vector<8x32xf32>
    %c0_103 = arith.constant 0 : index
    %c0_104 = arith.constant 0 : index
    %241 = vector.load %arg19[%c0_103, %c0_104] : memref<1x32xf32, #tpu.memory_space<vmem>>, vector<1x32xf32>
    %242 = vector.broadcast %241 : vector<1x32xf32> to vector<8x32xf32>
    %243 = arith.mulf %240, %242 : vector<8x32xf32>
    %c0_105 = arith.constant 0 : index
    %c0_106 = arith.constant 0 : index
    %244 = vector.load %arg20[%c0_105, %c0_106] : memref<1x32xf32, #tpu.memory_space<vmem>>, vector<1x32xf32>
    %245 = vector.broadcast %244 : vector<1x32xf32> to vector<8x32xf32>
    %246 = arith.addf %243, %245 : vector<8x32xf32>
    %247 = arith.addf %123, %246 : vector<8x32xf32>
    %248 = arith.truncf %247 : vector<8x32xf32> to vector<8x32xbf16>
    %c0_107 = arith.constant 0 : index
    %c0_108 = arith.constant 0 : index
    %249 = vector.load %arg21[%c0_107, %c0_108] : memref<32x64xbf16, #tpu.memory_space<vmem>>, vector<32x64xbf16>
    %cst_109 = arith.constant dense<0.000000e+00> : vector<8x64xf32>
    %250 = tpu.matmul %248, %249, %cst_109 {dimension_numbers = #tpu.dot_dimension_numbers<[1], [0], [0], [1], [0, 0, 1, 1], [], []>} : vector<8x32xbf16>, vector<32x64xbf16>, vector<8x64xf32> -> vector<8x64xf32>
    %c0_110 = arith.constant 0 : index
    %c0_111 = arith.constant 0 : index
    %251 = vector.load %arg22[%c0_110, %c0_111] : memref<1x64xf32, #tpu.memory_space<vmem>>, vector<1x64xf32>
    %252 = vector.broadcast %251 : vector<1x64xf32> to vector<8x64xf32>
    %253 = arith.addf %250, %252 : vector<8x64xf32>
    %cst_112 = arith.constant 0.000000e+00 : f32
    %254 = vector.broadcast %cst_112 : f32 to vector<8x64xf32>
    %255 = arith.maximumf %253, %254 : vector<8x64xf32>
    %256 = arith.truncf %255 : vector<8x64xf32> to vector<8x64xbf16>
    %c0_113 = arith.constant 0 : index
    %c0_114 = arith.constant 0 : index
    %257 = vector.load %arg23[%c0_113, %c0_114] : memref<64x32xbf16, #tpu.memory_space<vmem>>, vector<64x32xbf16>
    %cst_115 = arith.constant dense<0.000000e+00> : vector<8x32xf32>
    %258 = tpu.matmul %256, %257, %cst_115 {dimension_numbers = #tpu.dot_dimension_numbers<[1], [0], [0], [1], [0, 0, 1, 1], [], []>} : vector<8x64xbf16>, vector<64x32xbf16>, vector<8x32xf32> -> vector<8x32xf32>
    %c0_116 = arith.constant 0 : index
    %c0_117 = arith.constant 0 : index
    %259 = vector.load %arg24[%c0_116, %c0_117] : memref<1x32xf32, #tpu.memory_space<vmem>>, vector<1x32xf32>
    %260 = vector.broadcast %259 : vector<1x32xf32> to vector<8x32xf32>
    %261 = arith.addf %258, %260 : vector<8x32xf32>
    %cst_118 = arith.constant dense<0.000000e+00> : vector<8xf32>
    %262 = vector.multi_reduction <add>, %261, %cst_118 [1] : vector<8x32xf32> to vector<8xf32>
    %263 = vector.shape_cast %262 : vector<8xf32> to vector<8x1xf32>
    %cst_119 = arith.constant 3.200000e+01 : f32
    %264 = vector.broadcast %cst_119 : f32 to vector<8x1xf32>
    %265 = arith.divf %263, %264 : vector<8x1xf32>
    %266 = vector.broadcast %265 : vector<8x1xf32> to vector<8x32xf32>
    %267 = arith.subf %261, %266 : vector<8x32xf32>
    %268 = arith.mulf %267, %267 : vector<8x32xf32>
    %cst_120 = arith.constant dense<0.000000e+00> : vector<8xf32>
    %269 = vector.multi_reduction <add>, %268, %cst_120 [1] : vector<8x32xf32> to vector<8xf32>
    %270 = vector.shape_cast %269 : vector<8xf32> to vector<8x1xf32>
    %cst_121 = arith.constant 3.200000e+01 : f32
    %271 = vector.broadcast %cst_121 : f32 to vector<8x1xf32>
    %272 = arith.divf %270, %271 : vector<8x1xf32>
    %cst_122 = arith.constant 9.99999974E-6 : f32
    %273 = vector.broadcast %cst_122 : f32 to vector<8x1xf32>
    %274 = arith.addf %272, %273 : vector<8x1xf32>
    %275 = math.rsqrt %274 : vector<8x1xf32>
    %276 = vector.broadcast %275 : vector<8x1xf32> to vector<8x32xf32>
    %277 = arith.mulf %267, %276 : vector<8x32xf32>
    %c0_123 = arith.constant 0 : index
    %c0_124 = arith.constant 0 : index
    %278 = vector.load %arg25[%c0_123, %c0_124] : memref<1x32xf32, #tpu.memory_space<vmem>>, vector<1x32xf32>
    %279 = vector.broadcast %278 : vector<1x32xf32> to vector<8x32xf32>
    %280 = arith.mulf %277, %279 : vector<8x32xf32>
    %c0_125 = arith.constant 0 : index
    %c0_126 = arith.constant 0 : index
    %281 = vector.load %arg26[%c0_125, %c0_126] : memref<1x32xf32, #tpu.memory_space<vmem>>, vector<1x32xf32>
    %282 = vector.broadcast %281 : vector<1x32xf32> to vector<8x32xf32>
    %283 = arith.addf %280, %282 : vector<8x32xf32>
    %284 = arith.addf %247, %283 : vector<8x32xf32>
    %c0_127 = arith.constant 0 : index
    %c0_128 = arith.constant 0 : index
    %c0_129 = arith.constant 0 : index
    %285 = vector.load %arg27[%c0_127, %c0_128, %c0_129] : memref<1x8x32xf32, #tpu.memory_space<vmem>>, vector<1x8x32xf32>
    %286 = vector.shape_cast %285 : vector<1x8x32xf32> to vector<8x32xf32>
    %287 = vector.shape_cast %284 : vector<8x32xf32> to vector<1x8x32xf32>
    tpu.vector_store %arg27[%c0_127, %c0_128, %c0_129], %287 {strides = array<i32>} : memref<1x8x32xf32, #tpu.memory_space<vmem>>, vector<1x8x32xf32>,
    return
  }
  func.func @transform_0(%arg0: i32, %arg1: i32) -> (i32, i32, i32) {
    %c0_i32 = arith.constant 0 : i32
    %c0_i32_0 = arith.constant 0 : i32
    %c0_i32_1 = arith.constant 0 : i32
    return %arg0, %c0_i32, %c0_i32_0 : i32, i32, i32
  }
  func.func @transform_1(%arg0: i32, %arg1: i32) -> (i32, i32, i32) {
    %c0_i32 = arith.constant 0 : i32
    %c0_i32_0 = arith.constant 0 : i32
    %c0_i32_1 = arith.constant 0 : i32
    return %arg0, %c0_i32, %c0_i32_0 : i32, i32, i32
  }
  func.func @transform_2(%arg0: i32, %arg1: i32) -> (i32, i32, i32) {
    %c0_i32 = arith.constant 0 : i32
    %c0_i32_0 = arith.constant 0 : i32
    %c0_i32_1 = arith.constant 0 : i32
    return %arg0, %c0_i32, %c0_i32_0 : i32, i32, i32
  }
  func.func @transform_3(%arg0: i32, %arg1: i32) -> (i32, i32, i32) {
    %c0_i32 = arith.constant 0 : i32
    %c0_i32_0 = arith.constant 0 : i32
    %c0_i32_1 = arith.constant 0 : i32
    return %arg0, %c0_i32, %c0_i32_0 : i32, i32, i32
  }
  func.func @transform_4(%arg0: i32, %arg1: i32) -> (i32, i32, i32) {
    %c0_i32 = arith.constant 0 : i32
    %c0_i32_0 = arith.constant 0 : i32
    %c0_i32_1 = arith.constant 0 : i32
    return %arg0, %c0_i32, %c0_i32_0 : i32, i32, i32
  }
  func.func @transform_5(%arg0: i32, %arg1: i32) -> (i32, i32) {
    %c0_i32 = arith.constant 0 : i32
    %c0_i32_0 = arith.constant 0 : i32
    %c0_i32_1 = arith.constant 0 : i32
    return %c0_i32, %c0_i32_0 : i32, i32
  }
  func.func @transform_6(%arg0: i32, %arg1: i32) -> (i32, i32) {
    %c0_i32 = arith.constant 0 : i32
    %c0_i32_0 = arith.constant 0 : i32
    %c0_i32_1 = arith.constant 0 : i32
    return %c0_i32, %c0_i32_0 : i32, i32
  }
  func.func @transform_7(%arg0: i32, %arg1: i32) -> (i32, i32) {
    %c0_i32 = arith.constant 0 : i32
    %c0_i32_0 = arith.constant 0 : i32
    %c0_i32_1 = arith.constant 0 : i32
    return %c0_i32, %c0_i32_0 : i32, i32
  }
  func.func @transform_8(%arg0: i32, %arg1: i32) -> (i32, i32) {
    %c0_i32 = arith.constant 0 : i32
    %c0_i32_0 = arith.constant 0 : i32
    %c0_i32_1 = arith.constant 0 : i32
    return %c0_i32, %c0_i32_0 : i32, i32
  }
  func.func @transform_9(%arg0: i32, %arg1: i32) -> (i32, i32) {
    %c0_i32 = arith.constant 0 : i32
    %c0_i32_0 = arith.constant 0 : i32
    %c0_i32_1 = arith.constant 0 : i32
    return %c0_i32, %c0_i32_0 : i32, i32
  }
  func.func @transform_10(%arg0: i32, %arg1: i32) -> (i32, i32) {
    %c0_i32 = arith.constant 0 : i32
    %c0_i32_0 = arith.constant 0 : i32
    %c0_i32_1 = arith.constant 0 : i32
    return %c0_i32, %c0_i32_0 : i32, i32
  }
  func.func @transform_11(%arg0: i32, %arg1: i32) -> (i32, i32) {
    %c0_i32 = arith.constant 0 : i32
    %c0_i32_0 = arith.constant 0 : i32
    %c0_i32_1 = arith.constant 0 : i32
    return %c0_i32, %c0_i32_0 : i32, i32
  }
  func.func @transform_12(%arg0: i32, %arg1: i32) -> (i32, i32) {
    %c0_i32 = arith.constant 0 : i32
    %c0_i32_0 = arith.constant 0 : i32
    %c0_i32_1 = arith.constant 0 : i32
    return %c0_i32, %c0_i32_0 : i32, i32
  }
  func.func @transform_13(%arg0: i32, %arg1: i32) -> (i32, i32) {
    %c0_i32 = arith.constant 0 : i32
    %c0_i32_0 = arith.constant 0 : i32
    %c0_i32_1 = arith.constant 0 : i32
    return %c0_i32, %c0_i32_0 : i32, i32
  }
  func.func @transform_14(%arg0: i32, %arg1: i32) -> (i32, i32) {
    %c0_i32 = arith.constant 0 : i32
    %c0_i32_0 = arith.constant 0 : i32
    %c0_i32_1 = arith.constant 0 : i32
    return %c0_i32, %c0_i32_0 : i32, i32
  }
  func.func @transform_15(%arg0: i32, %arg1: i32) -> (i32, i32) {
    %c0_i32 = arith.constant 0 : i32
    %c0_i32_0 = arith.constant 0 : i32
    %c0_i32_1 = arith.constant 0 : i32
    return %c0_i32, %c0_i32_0 : i32, i32
  }
  func.func @transform_16(%arg0: i32, %arg1: i32) -> (i32, i32) {
    %c0_i32 = arith.constant 0 : i32
    %c0_i32_0 = arith.constant 0 : i32
    %c0_i32_1 = arith.constant 0 : i32
    return %c0_i32, %c0_i32_0 : i32, i32
  }
  func.func @transform_17(%arg0: i32, %arg1: i32) -> (i32, i32) {
    %c0_i32 = arith.constant 0 : i32
    %c0_i32_0 = arith.constant 0 : i32
    %c0_i32_1 = arith.constant 0 : i32
    return %c0_i32, %c0_i32_0 : i32, i32
  }
  func.func @transform_18(%arg0: i32, %arg1: i32) -> (i32, i32) {
    %c0_i32 = arith.constant 0 : i32
    %c0_i32_0 = arith.constant 0 : i32
    %c0_i32_1 = arith.constant 0 : i32
    return %c0_i32, %c0_i32_0 : i32, i32
  }
  func.func @transform_19(%arg0: i32, %arg1: i32) -> (i32, i32) {
    %c0_i32 = arith.constant 0 : i32
    %c0_i32_0 = arith.constant 0 : i32
    %c0_i32_1 = arith.constant 0 : i32
    return %c0_i32, %c0_i32_0 : i32, i32
  }
  func.func @transform_20(%arg0: i32, %arg1: i32) -> (i32, i32) {
    %c0_i32 = arith.constant 0 : i32
    %c0_i32_0 = arith.constant 0 : i32
    %c0_i32_1 = arith.constant 0 : i32
    return %c0_i32, %c0_i32_0 : i32, i32
  }
  func.func @transform_21(%arg0: i32, %arg1: i32) -> (i32, i32) {
    %c0_i32 = arith.constant 0 : i32
    %c0_i32_0 = arith.constant 0 : i32
    %c0_i32_1 = arith.constant 0 : i32
    return %c0_i32, %c0_i32_0 : i32, i32
  }
  func.func @transform_22(%arg0: i32, %arg1: i32) -> (i32, i32) {
    %c0_i32 = arith.constant 0 : i32
    %c0_i32_0 = arith.constant 0 : i32
    %c0_i32_1 = arith.constant 0 : i32
    return %c0_i32, %c0_i32_0 : i32, i32
  }
  func.func @transform_23(%arg0: i32, %arg1: i32) -> (i32, i32) {
    %c0_i32 = arith.constant 0 : i32
    %c0_i32_0 = arith.constant 0 : i32
    %c0_i32_1 = arith.constant 0 : i32
    return %c0_i32, %c0_i32_0 : i32, i32
  }
  func.func @transform_24(%arg0: i32, %arg1: i32) -> (i32, i32) {
    %c0_i32 = arith.constant 0 : i32
    %c0_i32_0 = arith.constant 0 : i32
    %c0_i32_1 = arith.constant 0 : i32
    return %c0_i32, %c0_i32_0 : i32, i32
  }
  func.func @transform_25(%arg0: i32, %arg1: i32) -> (i32, i32, i32) {
    %c0_i32 = arith.constant 0 : i32
    %c0_i32_0 = arith.constant 0 : i32
    return %arg0, %arg1, %c0_i32 : i32, i32, i32
  }
}

</mosaic_0001>

<bundles_post_ra>
// kernel: tpu_custom_call.1
= control target key start
LH: loop header
LB: loop body
LE: loop exit
PB: predicated region body
PF: predicated region fallthrough
CT: control target
= control target key end

     0   :  { %s4731_s0 = inlined_call_operand.vmem [shape: f32[2,8,32], index: 0, kind: input, shape index: {}]   ;;  %s4732_s1 = inlined_call_operand.vmem [shape: f32[2,8,32], index: 1, kind: input, shape index: {}]   ;;  %s4733_s2 = inlined_call_operand.vmem [shape: f32[2,8,32], index: 2, kind: input, shape index: {}]   ;;  %s4734_s3 = inlined_call_operand.hbm [shape: f32[2,1,8], index: 3, kind: input, shape index: {}]   ;;  %s4735_s4 = inlined_call_operand.vmem [shape: f32[2,1,1], index: 4, kind: input, shape index: {}]   ;;  %s4736_s5 = inlined_call_operand.hbm [shape: bf16[32,32], index: 5, kind: input, shape index: {}]   ;;  %s4737_s6 = inlined_call_operand.hbm [shape: bf16[32,32], index: 6, kind: input, shape index: {}]   ;;  %s4738_s7 = inlined_call_operand.hbm [shape: bf16[32,32], index: 7, kind: input, shape index: {}]   ;;  %s4739_s8 = inlined_call_operand.vmem [shape: bf16[32,32], index: 8, kind: input, shape index: {}]   ;;  %s4740_s9 = inlined_call_operand.hbm [shape: f32[1,32], index: 9, kind: input, shape index: {}]   ;;  %s4741_s10 = inlined_call_operand.hbm [shape: f32[1,32], index: 10, kind: input, shape index: {}]   ;;  %s4742_s11 = inlined_call_operand.hbm [shape: f32[1,32], index: 11, kind: input, shape index: {}]   ;;  %s4743_s12 = inlined_call_operand.vmem [shape: bf16[32,32], index: 12, kind: input, shape index: {}]   ;;  %s4744_s13 = inlined_call_operand.hbm [shape: bf16[32,32], index: 13, kind: input, shape index: {}]   ;;  %s4745_s14 = inlined_call_operand.hbm [shape: bf16[32,32], index: 14, kind: input, shape index: {}]   ;;  %s4746_s15 = inlined_call_operand.hbm [shape: bf16[32,32], index: 15, kind: input, shape index: {}]   ;;  %s4747_s16 = inlined_call_operand.hbm [shape: f32[1,32], index: 16, kind: input, shape index: {}]   ;;  %s4748_s17 = inlined_call_operand.vmem [shape: f32[1,32], index: 17, kind: input, shape index: {}]   ;;  %s4749_s18 = inlined_call_operand.vmem [shape: f32[1,32], index: 18, kind: input, shape index: {}]   ;;  %s4750_s19 = inlined_call_operand.vmem [shape: bf16[32,64], index: 19, kind: input, shape index: {}]   ;;  %s4751_s20 = inlined_call_operand.vmem [shape: f32[1,64], index: 20, kind: input, shape index: {}]   ;;  %s4752_s21 = inlined_call_operand.vmem [shape: bf16[64,32], index: 21, kind: input, shape index: {}]   ;;  %s4753_s22 = inlined_call_operand.vmem [shape: f32[1,32], index: 22, kind: input, shape index: {}]   ;;  %s4754_s23 = inlined_call_operand.vmem [shape: f32[1,32], index: 23, kind: input, shape index: {}]   ;;  %s4755_s24 = inlined_call_operand.vmem [shape: f32[1,32], index: 24, kind: input, shape index: {}]   ;;  %s4756_s25 = inlined_call_operand.hbm [shape: f32[2,8,32], index: 25, kind: output, shape index: {}]  }
   0x1   :  { %4787 = sst [smem:[#allocation30_spill]] %s4731_s0 }
   0x2   :  { %4788 = sst [smem:[#allocation31_spill]] %s4732_s1 }
   0x3   :  { %4789 = sst [smem:[#allocation32_spill]] %s4733_s2 }
   0x4   :  { %4790 = sst [smem:[#allocation33_spill]] %s4734_s3 }
   0x5   :  { %4791 = sst [smem:[#allocation34_spill]] %s4736_s5 }
   0x6   :  { %4792 = sst [smem:[#allocation35_spill]] %s4737_s6 }
   0x7   :  { %4793 = sst [smem:[#allocation36_spill]] %s4738_s7 }
   0x8   :  { %4794 = sst [smem:[#allocation37_spill]] %s4739_s8 }
   0x9   :  { %4795 = sst [smem:[#allocation38_spill]] %s4740_s9 }
   0xa   :  { %4796 = sst [smem:[#allocation39_spill]] %s4741_s10 }
   0xb   :  { %4797 = sst [smem:[#allocation40_spill]] %s4742_s11 }
   0xc   :  { %4798 = sst [smem:[#allocation41_spill]] %s4743_s12 }
   0xd   :  { %4799 = sst [smem:[#allocation42_spill]] %s4744_s13 }
   0xe   :  { %4800 = sst [smem:[#allocation43_spill]] %s4745_s14 }
   0xf   :  { %4801 = sst [smem:[#allocation44_spill]] %s4746_s15 }
  0x10   :  { %4802 = sst [smem:[#allocation45_spill]] %s4748_s17 }
  0x11   :  { %4803 = sst [smem:[#allocation46_spill]] %s4749_s18 }
  0x12   :  { %4804 = sst [smem:[#allocation47_spill]] %s4750_s19 }
  0x13   :  { %4805 = sst [smem:[#allocation48_spill]] %s4751_s20 }
  0x14   :  { %4806 = sst [smem:[#allocation49_spill]] %s4752_s21 }
  0x15   :  { %4807 = sst [smem:[#allocation50_spill]] %s4753_s22 }
  0x16   :  { %4808 = sst [smem:[#allocation51_spill]] %s4754_s23 }
  0x17   :  { %4809 = sst [smem:[#allocation52_spill]] %s4755_s24 }
  0x18   :  { %4810 = sst [smem:[#allocation53_spill]] %s4756_s25 }
  0x19   :  { %30 = vsyncpa [#allocation4], 0 }
  0x1a   :  { %32 = vsyncpa [#allocation4 + $0x1], 0 }
  0x1b   :  { %33 = vsyncpa [#allocation7], 0 }
  0x1c   :  { %34 = vsyncpa [#allocation10], 0 }
  0x1d   :  { %35 = vsyncpa [#allocation13], 0 }
  0x1e   :  { %36 = vsyncpa [#allocation16], 0 }
  0x1f   :  { %37 = vsyncpa [#allocation19], 0 }
  0x20   :  { %38 = vsyncpa [#allocation5], 0 }
  0x21   :  { %40 = vsyncpa [#allocation5 + $0x1], 0  ;;  %s4029_s29 = smov 0   ;;  %s4031_s2 = smov 0  }
  0x22   :  { %s4033_s6 = smov 0   ;;  %s4035_s30 = smov 0  }
  0x23   :  { %s4037_s7 = smov 0   ;;  %s4039_s3 = smov 0  }
  0x24 LB: > { %4811 = sst [smem:[#allocation29_spill]] %s3866_s30  ;;  %s4763_s26 = sadd.s32 4294967295, %s3874_s3   ;;  %s3874_s3 = sphi %s4039_s3, %s46_s3   ;;  %s3870_s7 = sphi %s4037_s7, %s4865_s7   ;;  %s3866_s30 = sphi %s4035_s30, %s4864_s30   ;;  %s3862_s6 = sphi %s4033_s6, %s4863_s6   ;;  %s3858_s2 = sphi %s4031_s2, %s4862_s2   ;;  %s3854_s29 = sphi %s4029_s29, %s4861_s29  }
  0x25   : > { %p2893_p0 = scmp.ge.s32.totalorder %s3874_s3, 1  ;;  %p4063_p1 = scmp.eq.s32.totalorder %s4763_s26, 0 }
  0x26   : > { %p641_p2 = scmp.lt.s32.totalorder %s3874_s3, 3  ;;  %s3876_s27 = smov [#allocation6]  }
  0x27   : > { %s4812_s1 = scalar_select %p4063_p1, 1, 0 }
  0x28   : > { %p4068_p3 = pnand %p2893_p0, %p641_p2  ;;  %s653_s4 = sshll.u32 %s3876_s27, 4  ;;  %s4072_s4 = int_to_ptr.vmem [resolvable:$true] %s653_s4 }
  0x29   : > { %s3877_s9 = smov [#allocation9]   ;;  %s3878_s0 = smov [#allocation12]  }
  0x2a   : > { %s4813_s8 = scalar_select %p4068_p3, 1, 0 }
  0x2b   : > { %p3272_p4 = pneg %p4068_p3  ;;  %s679_s5 = sshll.u32 %s3877_s9, 4  ;;  %s4083_s5 = int_to_ptr.vmem [resolvable:$true] %s679_s5 }
  0x2c   : > { %s4085_s26 = sshll.u32 %s3878_s0, 4  ;;  %s4815_s24 = sld [smem:[#allocation34_spill]]  ;;  %s708_s26 = int_to_ptr.vmem [resolvable:$true] %s4085_s26 }
  0x2d   : > { %p4079_p6 = pnand %p3272_p4, %p4063_p1 }
  0x2f   : > { %p4095_p8 = pneg %p4079_p6 }
  0x32   : > { %s3462_s23 = scalar_lea.hbm %s4815_s24, 256 }
  0x33   : > { %p3463_p7 = scmp.ne.s32.totalorder %s4815_s24, %s3462_s23  ;;  %p3469_p11 = scmp.lt.u32.totalorder %s3462_s23, %s4815_s24 }
  0x35   : > { %p3465_p9 = pnand %p4095_p8, %p3463_p7 }
  0x37   : > { %p3466_p10 = pneg %p3465_p9 }
  0x39   : > { %p3471_p12 = pnand %p3469_p11, %p3466_p10 }
  0x3b   : > { %3474 = shalt.err (!%p3471_p12)
}
  0x3c   : > { %s3475_s20 = scalar_lea.vmem %s4072_s4, 256  ;;  %p3483_p4 = scmp.lt.s32.totalorder %s4072_s4, %s4072_s4 }
  0x3d   : > { %p3476_p13 = scmp.ne.s32.totalorder %s4072_s4, %s3475_s20  ;;  %p3484_p5 = scmp.lt.s32.totalorder %s3475_s20, %s3475_s20 }
  0x3f   : > { %p3478_p0 = pnand %p3476_p13, %p4095_p8  ;;  %p3485_p7 = por %p3484_p5, %p3483_p4 }
  0x41   : > { %p3479_p2 = pneg %p3478_p0 }
  0x43   : > { %p3486_p9 = pnand %p3485_p7, %p3479_p2 }
  0x45   : > { %3489 = shalt.err (!%p3486_p9)
}
  0x46   : > { %s4772_s22 = smov 64   ;;  %s4774_s23 = smov 4  }
  0x47   : > { %3275 = dma.hbm_to_vmem [thread:$0]  (!%p4079_p6), %s4815_s24, 256, %s4072_s4, [#allocation7], %s4772_s22, %s4772_s22, %s4774_s23  }
  0x48   : > { %s4817_s17 = sld [smem:[#allocation36_spill]] }
  0x4e   : > { %s3490_s20 = scalar_lea.hbm %s4817_s17, 256 }
  0x4f   : > { %p3491_p5 = scmp.ne.s32.totalorder %s4817_s17, %s3490_s20  ;;  %p3497_p12 = scmp.lt.u32.totalorder %s3490_s20, %s4817_s17 }
  0x51   : > { %p3493_p10 = pnand %p3491_p5, %p4095_p8 }
  0x53   : > { %p3494_p11 = pneg %p3493_p10 }
  0x55   : > { %p3499_p13 = pnand %p3497_p12, %p3494_p11 }
  0x57   : > { %3502 = shalt.err (!%p3499_p13)
}
  0x58   : > { %s3503_s4 = scalar_lea.vmem %s4083_s5, 256  ;;  %p3511_p7 = scmp.lt.s32.totalorder %s4083_s5, %s4083_s5 }
  0x59   : > { %p3504_p0 = scmp.ne.s32.totalorder %s4083_s5, %s3503_s4  ;;  %p3512_p9 = scmp.lt.s32.totalorder %s3503_s4, %s3503_s4 }
  0x5b   : > { %p3506_p2 = pnand %p3504_p0, %p4095_p8  ;;  %p3513_p5 = por %p3512_p9, %p3511_p7 }
  0x5d   : > { %p3507_p4 = pneg %p3506_p2 }
  0x5f   : > { %p3514_p10 = pnand %p3513_p5, %p3507_p4 }
  0x61   : > { %3517 = shalt.err (!%p3514_p10)
}
  0x62   : > { %3281 = dma.hbm_to_vmem [thread:$0]  (!%p4079_p6), %s4817_s17, 256, %s4083_s5, [#allocation10], %s4772_s22, %s4772_s22, %s4774_s23  }
  0x63   : > { %s4818_s10 = sld [smem:[#allocation39_spill]] }
  0x69   : > { %s3518_s25 = scalar_lea.hbm %s4818_s10, 16 }
  0x6a   : > { %p3519_p11 = scmp.ne.s32.totalorder %s4818_s10, %s3518_s25  ;;  %p3525_p0 = scmp.lt.u32.totalorder %s3518_s25, %s4818_s10 }
  0x6c   : > { %p3521_p12 = pnand %p3519_p11, %p4095_p8 }
  0x6e   : > { %p3522_p13 = pneg %p3521_p12 }
  0x70   : > { %p3527_p2 = pnand %p3525_p0, %p3522_p13 }
  0x72   : > { %3530 = shalt.err (!%p3527_p2)
}
  0x73   : > { %s3531_s4 = scalar_lea.vmem %s708_s26, 16  ;;  %s3538_s5 = scalar_lea.vmem %s708_s26, 32 }
  0x74   : > { %p3532_p4 = scmp.ne.s32.totalorder %s708_s26, %s3531_s4  ;;  %p3539_p5 = scmp.lt.s32.totalorder %s708_s26, %s708_s26 }
  0x75   : > { %p3540_p10 = scmp.lt.s32.totalorder %s3538_s5, %s3531_s4 }
  0x76   : > { %p3534_p7 = pnand %p3532_p4, %p4095_p8 }
  0x77   : > { %p3541_p3 = por %p3540_p10, %p3539_p5 }
  0x78   : > { %p3535_p9 = pneg %p3534_p7 }
  0x7a   : > { %p3542_p1 = pnand %p3541_p3, %p3535_p9 }
  0x7c   : > { %3545 = shalt.err (!%p3542_p1)
}
  0x7d   : > { %3287 = dma.hbm_to_vmem [thread:$0]  (!%p4079_p6), %s4818_s10, 16, %s708_s26, [#allocation13]  }
  0x7e   : > { %s3881_s21 = smov [#allocation15]   ;;  %s3882_s25 = smov [#allocation18]  }
  0x7f   : > { %s731_s30 = sshll.u32 %s3881_s21, 4  ;;  %s757_s27 = sshll.u32 %s3882_s25, 4  ;;  %s732_s30 = int_to_ptr.vmem [resolvable:$true] %s731_s30  ;;  %s758_s27 = int_to_ptr.vmem [resolvable:$true] %s757_s27 }
  0x80   : > { %s4819_s13 = sld [smem:[#allocation42_spill]] }
  0x86   : > { %s3546_s20 = scalar_lea.hbm %s4819_s13, 256 }
  0x87   : > { %p3547_p1 = scmp.ne.s32.totalorder %s4819_s13, %s3546_s20  ;;  %p3553_p12 = scmp.lt.u32.totalorder %s3546_s20, %s4819_s13 }
  0x89   : > { %p3549_p3 = pnand %p3547_p1, %p4095_p8 }
  0x8b   : > { %p3550_p11 = pneg %p3549_p3 }
  0x8d   : > { %p3555_p13 = pnand %p3553_p12, %p3550_p11 }
  0x8f   : > { %3558 = shalt.err (!%p3555_p13)
}
  0x90   : > { %s3559_s26 = scalar_lea.vmem %s732_s30, 256  ;;  %p3567_p7 = scmp.lt.s32.totalorder %s732_s30, %s732_s30 }
  0x91   : > { %p3560_p0 = scmp.ne.s32.totalorder %s732_s30, %s3559_s26  ;;  %p3568_p9 = scmp.lt.s32.totalorder %s3559_s26, %s3559_s26 }
  0x93   : > { %p3562_p2 = pnand %p3560_p0, %p4095_p8  ;;  %p3569_p5 = por %p3568_p9, %p3567_p7 }
  0x95   : > { %p3563_p4 = pneg %p3562_p2 }
  0x97   : > { %p3570_p10 = pnand %p3569_p5, %p3563_p4 }
  0x99   : > { %3573 = shalt.err (!%p3570_p10)
}
  0x9a   : > { %s4820_s19 = smov 64   ;;  %s4821_s15 = sld [smem:[#allocation44_spill]] }
  0x9b   : > { %3293 = dma.hbm_to_vmem [thread:$0]  (!%p4079_p6), %s4819_s13, 256, %s732_s30, [#allocation16], %s4820_s19, %s4820_s19, %s4774_s23  }
  0xa0   : > { %s3574_s0 = scalar_lea.hbm %s4821_s15, 256 }
  0xa1   : > { %p3575_p1 = scmp.ne.s32.totalorder %s4821_s15, %s3574_s0  ;;  %p3581_p12 = scmp.lt.u32.totalorder %s3574_s0, %s4821_s15 }
  0xa3   : > { %p3577_p3 = pnand %p3575_p1, %p4095_p8 }
  0xa5   : > { %p3578_p11 = pneg %p3577_p3 }
  0xa7   : > { %p3583_p13 = pnand %p3581_p12, %p3578_p11 }
  0xa9   : > { %3586 = shalt.err (!%p3583_p13)
}
  0xaa   : > { %s3587_s26 = scalar_lea.vmem %s758_s27, 256  ;;  %p3595_p7 = scmp.lt.s32.totalorder %s758_s27, %s758_s27 }
  0xab   : > { %p3588_p0 = scmp.ne.s32.totalorder %s758_s27, %s3587_s26  ;;  %p3596_p9 = scmp.lt.s32.totalorder %s3587_s26, %s3587_s26 }
  0xad   : > { %p3590_p2 = pnand %p3588_p0, %p4095_p8  ;;  %p3597_p5 = por %p3596_p9, %p3595_p7 }
  0xaf   : > { %p3591_p4 = pneg %p3590_p2 }
  0xb1   : > { %p3598_p10 = pnand %p3597_p5, %p3591_p4 }
  0xb3   : > { %3601 = shalt.err (!%p3598_p10)
}
  0xb4   : > { %3299 = dma.hbm_to_vmem [thread:$0]  (!%p4079_p6), %s4821_s15, 256, %s758_s27, [#allocation19], %s4820_s19, %s4820_s19, %s4774_s23  }
  0xb5   : > { %s3883_s21 = smov [#allocation8]   ;;  %s3884_s9 = smov [#allocation11]  }
  0xb6   : > { %s666_s25 = sshll.u32 %s3883_s21, 4  ;;  %s696_s0 = sshll.u32 %s3884_s9, 4  ;;  %s667_s25 = int_to_ptr.vmem [resolvable:$true] %s666_s25  ;;  %s697_s0 = int_to_ptr.vmem [resolvable:$true] %s696_s0 }
  0xb7   : > { %s4822_s5 = sld [smem:[#allocation35_spill]] }
  0xbd   : > { %s3602_s12 = scalar_lea.hbm %s4822_s5, 256 }
  0xbe   : > { %p3603_p1 = scmp.ne.s32.totalorder %s4822_s5, %s3602_s12  ;;  %p3609_p12 = scmp.lt.u32.totalorder %s3602_s12, %s4822_s5 }
  0xc0   : > { %p3605_p3 = pnand %p3603_p1, %p4095_p8 }
  0xc2   : > { %p3606_p11 = pneg %p3605_p3 }
  0xc4   : > { %p3611_p13 = pnand %p3609_p12, %p3606_p11 }
  0xc6   : > { %3614 = shalt.err (!%p3611_p13)
}
  0xc7   : > { %s3615_s27 = scalar_lea.vmem %s667_s25, 256  ;;  %p3623_p7 = scmp.lt.s32.totalorder %s667_s25, %s667_s25 }
  0xc8   : > { %p3616_p0 = scmp.ne.s32.totalorder %s667_s25, %s3615_s27  ;;  %p3624_p9 = scmp.lt.s32.totalorder %s3615_s27, %s3615_s27 }
  0xca   : > { %p3618_p2 = pnand %p3616_p0, %p4095_p8  ;;  %p3625_p5 = por %p3624_p9, %p3623_p7 }
  0xcc   : > { %p3619_p4 = pneg %p3618_p2 }
  0xce   : > { %p3626_p10 = pnand %p3625_p5, %p3619_p4 }
  0xd0   : > { %3629 = shalt.err (!%p3626_p10)
}
  0xd1   : > { %3278 = dma.hbm_to_vmem [thread:$0]  (!%p4079_p6), %s4822_s5, 256, %s667_s25, [#allocation7], %s4820_s19, %s4820_s19, %s4774_s23  }
  0xd2   : > { %s4823_s9 = sld [smem:[#allocation38_spill]] }
  0xd8   : > { %s3630_s20 = scalar_lea.hbm %s4823_s9, 16 }
  0xd9   : > { %p3631_p1 = scmp.ne.s32.totalorder %s4823_s9, %s3630_s20  ;;  %p3637_p12 = scmp.lt.u32.totalorder %s3630_s20, %s4823_s9 }
  0xdb   : > { %p3633_p3 = pnand %p3631_p1, %p4095_p8 }
  0xdd   : > { %p3634_p11 = pneg %p3633_p3 }
  0xdf   : > { %p3639_p13 = pnand %p3637_p12, %p3634_p11 }
  0xe1   : > { %3642 = shalt.err (!%p3639_p13)
}
  0xe2   : > { %s3643_s27 = scalar_lea.vmem %s697_s0, 16  ;;  %s3650_s25 = scalar_lea.vmem %s697_s0, 32 }
  0xe3   : > { %p3644_p0 = scmp.ne.s32.totalorder %s697_s0, %s3643_s27  ;;  %p3651_p7 = scmp.lt.s32.totalorder %s697_s0, %s697_s0 }
  0xe4   : > { %p3652_p9 = scmp.lt.s32.totalorder %s3650_s25, %s3643_s27 }
  0xe5   : > { %p3646_p2 = pnand %p3644_p0, %p4095_p8 }
  0xe6   : > { %p3653_p5 = por %p3652_p9, %p3651_p7 }
  0xe7   : > { %p3647_p4 = pneg %p3646_p2 }
  0xe9   : > { %p3654_p10 = pnand %p3653_p5, %p3647_p4 }
  0xeb   : > { %3657 = shalt.err (!%p3654_p10)
}
  0xec   : > { %3284 = dma.hbm_to_vmem [thread:$0]  (!%p4079_p6), %s4823_s9, 16, %s697_s0, [#allocation10]  }
  0xed   : > { %s3885_s22 = smov [#allocation14]   ;;  %s3886_s20 = smov [#allocation17]  }
  0xee   : > { %s718_s21 = sshll.u32 %s3885_s22, 4  ;;  %s744_s4 = sshll.u32 %s3886_s20, 4  ;;  %s719_s21 = int_to_ptr.vmem [resolvable:$true] %s718_s21  ;;  %s745_s4 = int_to_ptr.vmem [resolvable:$true] %s744_s4 }
  0xef   : > { %s4824_s11 = sld [smem:[#allocation40_spill]] }
  0xf5   : > { %s3658_s30 = scalar_lea.hbm %s4824_s11, 16 }
  0xf6   : > { %p3659_p1 = scmp.ne.s32.totalorder %s4824_s11, %s3658_s30  ;;  %p3665_p12 = scmp.lt.u32.totalorder %s3658_s30, %s4824_s11 }
  0xf8   : > { %p3661_p3 = pnand %p3659_p1, %p4095_p8 }
  0xfa   : > { %p3662_p11 = pneg %p3661_p3 }
  0xfc   : > { %p3667_p13 = pnand %p3665_p12, %p3662_p11 }
  0xfe   : > { %3670 = shalt.err (!%p3667_p13)
}
  0xff   : > { %s3671_s0 = scalar_lea.vmem %s719_s21, 16  ;;  %s3678_s13 = scalar_lea.vmem %s719_s21, 32 }
 0x100   : > { %p3672_p0 = scmp.ne.s32.totalorder %s719_s21, %s3671_s0  ;;  %p3679_p7 = scmp.lt.s32.totalorder %s719_s21, %s719_s21 }
 0x101   : > { %p3680_p9 = scmp.lt.s32.totalorder %s3678_s13, %s3671_s0 }
 0x102   : > { %p3674_p2 = pnand %p3672_p0, %p4095_p8 }
 0x103   : > { %p3681_p5 = por %p3680_p9, %p3679_p7 }
 0x104   : > { %p3675_p4 = pneg %p3674_p2 }
 0x106   : > { %p3682_p10 = pnand %p3681_p5, %p3675_p4 }
 0x108   : > { %3685 = shalt.err (!%p3682_p10)
}
 0x109   : > { %3290 = dma.hbm_to_vmem [thread:$0]  (!%p4079_p6), %s4824_s11, 16, %s719_s21, [#allocation13]  }
 0x10a   : > { %s4825_s14 = sld [smem:[#allocation43_spill]] }
 0x110   : > { %s3686_s26 = scalar_lea.hbm %s4825_s14, 256 }
 0x111   : > { %p3687_p1 = scmp.ne.s32.totalorder %s4825_s14, %s3686_s26  ;;  %p3693_p12 = scmp.lt.u32.totalorder %s3686_s26, %s4825_s14 }
 0x113   : > { %p3689_p3 = pnand %p3687_p1, %p4095_p8 }
 0x115   : > { %p3690_p11 = pneg %p3689_p3 }
 0x117   : > { %p3695_p13 = pnand %p3693_p12, %p3690_p11 }
 0x119   : > { %3698 = shalt.err (!%p3695_p13)
}
 0x11a   : > { %s3699_s0 = scalar_lea.vmem %s745_s4, 256  ;;  %p3707_p7 = scmp.lt.s32.totalorder %s745_s4, %s745_s4 }
 0x11b   : > { %p3700_p0 = scmp.ne.s32.totalorder %s745_s4, %s3699_s0  ;;  %p3708_p9 = scmp.lt.s32.totalorder %s3699_s0, %s3699_s0 }
 0x11d   : > { %p3702_p2 = pnand %p3700_p0, %p4095_p8  ;;  %p3709_p5 = por %p3708_p9, %p3707_p7 }
 0x11f   : > { %p3703_p4 = pneg %p3702_p2 }
 0x121   : > { %p3710_p10 = pnand %p3709_p5, %p3703_p4 }
 0x123   : > { %3713 = shalt.err (!%p3710_p10)
}
 0x124   : > { %s4826_s21 = smov 4   ;;  %s3887_s20 = smov [#allocation20]  }
 0x125   : > { %3296 = dma.hbm_to_vmem [thread:$0]  (!%p4079_p6), %s4825_s14, 256, %s745_s4, [#allocation16], %s4820_s19, %s4820_s19, %s4826_s21  }
 0x126   : > { %s771_s23 = sshll.u32 %s3887_s20, 4  ;;  %s3714_s30 = scalar_lea.hbm %s4747_s16, 16  ;;  %s772_s23 = int_to_ptr.vmem [resolvable:$true] %s771_s23 }
 0x127   : > { %p3715_p1 = scmp.ne.s32.totalorder %s4747_s16, %s3714_s30  ;;  %p3721_p12 = scmp.lt.u32.totalorder %s3714_s30, %s4747_s16 }
 0x129   : > { %p3717_p3 = pnand %p3715_p1, %p4095_p8 }
 0x12b   : > { %p3718_p11 = pneg %p3717_p3 }
 0x12d   : > { %p3723_p13 = pnand %p3721_p12, %p3718_p11 }
 0x12f   : > { %3726 = shalt.err (!%p3723_p13)
}
 0x130   : > { %s3727_s19 = scalar_lea.vmem %s772_s23, 16  ;;  %s3734_s4 = scalar_lea.vmem %s772_s23, 32 }
 0x131   : > { %p3728_p0 = scmp.ne.s32.totalorder %s772_s23, %s3727_s19  ;;  %p3735_p7 = scmp.lt.s32.totalorder %s772_s23, %s772_s23 }
 0x132   : > { %p3736_p9 = scmp.lt.s32.totalorder %s3734_s4, %s3727_s19 }
 0x133   : > { %p3730_p2 = pnand %p3728_p0, %p4095_p8 }
 0x134   : > { %p3737_p5 = por %p3736_p9, %p3735_p7 }
 0x135   : > { %p3731_p4 = pneg %p3730_p2 }
 0x137   : > { %p3738_p10 = pnand %p3737_p5, %p3731_p4 }
 0x139   : > { %3741 = shalt.err (!%p3738_p10)
}
 0x13a   : > { %3302 = dma.hbm_to_vmem [thread:$0]  (!%p4079_p6), %s4747_s16, 16, %s772_s23, [#allocation19]  }
 0x13b   : > { %s2892_s18 = sadd.s32 4294967294, %s3874_s3   ;;  %s58_s22 = sadd.s32 1, %s3870_s7 }
 0x13c   : > { %p60_p8 = scmp.ge.s32.totalorder %s58_s22, 2  ;;  %s143_s28 = sadd.s32 1, %s3862_s6 }
 0x13d   : > { %p150_p1 = scmp.ne.s32.totalorder %s3862_s6, %s3858_s2  ;;  %p151_p3 = scmp.eq.s32.totalorder %s3874_s3, 0 }
 0x13e   : > { %s4867_s22 = smov (%p60_p8, %s58_s22), 0  ;;  %p156_p12 = scmp.ne.s32.totalorder %s3858_s2, %s3854_s29 }
 0x13f   : > { %p4310_p11 = por %p151_p3, %p150_p1  ;;  %s140_s23 = ssub.s32 %s3870_s7, %s4867_s22 }
 0x140   : > { %s4828_s12 = sadd.s32 4294967295, %s3874_s3   ;;  %p141_p13 = scmp.eq.s32.totalorder %s140_s23, 0 }
 0x141   : > { %p628_p6 = scmp.eq.s32.totalorder %s4828_s12, 1  ;;  %p4829_p0 = scmp.ne.s32.totalorder %s4812_s1, 0 }
 0x142   : > { %p634_p7 = scmp.eq.s32.totalorder %s2892_s18, 1  ;;  %p3321_p5 = scmp.lt.s32.totalorder %s3874_s3, 2 }
 0x143   : > { %p4322_p2 = por %p4829_p0, %p156_p12  ;;  %p4326_p4 = por %p628_p6, %p150_p1 }
 0x144   : > { %s4331_s27 = scalar_select %p141_p13, %s3862_s6, %s143_s28  }
 0x145   : > { %s4831_s30 = scalar_select %p4326_p4, 1, 0 }
 0x146   : > { %p4333_p9 = por %p634_p7, %p156_p12  ;;  %s827_s10 = sand.u32 1, %s3862_s6  }
 0x147   : > { %s2905_s0 = sshll.u32 %s3870_s7, 4  ;;  %s4833_s21 = sld [smem:[#allocation33_spill]] }
 0x148   : > { %s4832_s25 = scalar_select %p4333_p9, 1, 0 }
 0x149   : > { %s830_s23 = scalar_lea.vmem [#allocation3], %s827_s10  ;;  %p4349_p10 = pnand %p3321_p5, %p4310_p11 }
 0x14a   : > { %s837_s18 = sshll.u32 %s830_s23, 4  ;;  %s828_s12 = scalar_lea.sflag [#allocation4], %s827_s10  ;;  %s4345_s18 = int_to_ptr.vmem [resolvable:$true] %s837_s18 }
 0x14b   : > { %p3744_p1 = pneg %p4349_p10 }
 0x14d   : > { %s4343_s13 = scalar_lea.hbm %s4833_s21, %s2905_s0  ;;  %s3747_s4 = scalar_lea.hbm %s4833_s21, 32 }
 0x14e   : > { %s3742_s5 = scalar_lea.hbm %s4343_s13, 16  ;;  %p3748_p11 = scmp.lt.u32.totalorder %s4343_s13, %s4833_s21 }
 0x14f   : > { %p3743_p8 = scmp.ne.s32.totalorder %s4343_s13, %s3742_s5  ;;  %p3749_p6 = scmp.lt.u32.totalorder %s3747_s4, %s3742_s5 }
 0x150   : > { %p3751_p0 = scmp.lt.u32.totalorder %s3742_s5, %s4343_s13 }
 0x151   : > { %p3745_p3 = pnand %p3744_p1, %p3743_p8  ;;  %p3750_p13 = por %p3749_p6, %p3748_p11 }
 0x153   : > { %p3746_p12 = pneg %p3745_p3  ;;  %p3752_p7 = por %p3751_p0, %p3750_p13 }
 0x155   : > { %p3753_p5 = pnand %p3752_p7, %p3746_p12 }
 0x157   : > { %3756 = shalt.err (!%p3753_p5)
}
 0x158   : > { %s3757_s10 = scalar_lea.vmem %s4345_s18, 16  ;;  %s3888_s0 = smov [#allocation3]  }
 0x159   : > { %p3758_p8 = scmp.ne.s32.totalorder %s4345_s18, %s3757_s10  ;;  %s3762_s19 = sshll.u32 %s3888_s0, 4  ;;  %s3763_s19 = int_to_ptr.vmem [resolvable:$false] %s3762_s19 }
 0x15a   : > { %s3764_s20 = scalar_lea.vmem %s3763_s19, 32  ;;  %p3765_p4 = scmp.lt.s32.totalorder %s4345_s18, %s3763_s19 }
 0x15b   : > { %p3760_p3 = pnand %p3758_p8, %p3744_p1  ;;  %p3766_p11 = scmp.lt.s32.totalorder %s3764_s20, %s3757_s10 }
 0x15d   : > { %p3761_p9 = pneg %p3760_p3  ;;  %p3767_p6 = por %p3766_p11, %p3765_p4 }
 0x15f   : > { %p3768_p13 = pnand %p3767_p6, %p3761_p9 }
 0x161   : > { %3771 = shalt.err (!%p3768_p13)
}
 0x162   : > { %3306 = dma.hbm_to_vmem [thread:$0]  (!%p4349_p10), %s4343_s13, 16, %s4345_s18, %s828_s12  }
 0x163   : > { %p4835_p12 = scmp.ne.s32.totalorder %s4813_s8, 0 }
 0x164   : > { %s4381_s5 = sand.u32 (!%p4835_p12), 1, %s3858_s2  }
 0x165   : > { %852 = sbr.rel (%p4835_p12) target bundleno = 4648 (0x1228), region = 120  ;;  %s855_s4 = scalar_lea.sflag (!%p4835_p12), [#allocation4], %s4381_s5 }
 0x16c   : > { %3825 = dma.done.wait (%p4322_p2), %s855_s4, 16  }
 0x16d   : > { %3827 = vsyncadd (%p4322_p2), %s855_s4, 4294967280  ;;  %p4836_p4 = scmp.ne.s32.totalorder %s4812_s1, 0 }
 0x16f   : > { %3829 = dma.done.wait (%p4836_p4), [#allocation7], 512  }
 0x170   : > { %3831 = vsyncadd (%p4836_p4), [#allocation7], 4294966784 }
 0x171   : > { %3833 = dma.done.wait (%p4836_p4), [#allocation10], 272  }
 0x172   : > { %3835 = vsyncadd (%p4836_p4), [#allocation10], 4294967024 }
 0x173   : > { %3837 = dma.done.wait (%p4836_p4), [#allocation13], 32  }
 0x174   : > { %3839 = vsyncadd (%p4836_p4), [#allocation13], 4294967264 }
 0x175   : > { %3841 = dma.done.wait (%p4836_p4), [#allocation16], 512  }
 0x176   : > { %3843 = vsyncadd (%p4836_p4), [#allocation16], 4294966784 }
 0x177   : > { %3845 = dma.done.wait (%p4836_p4), [#allocation19], 272  }
 0x178   : > { %3847 = vsyncadd (%p4836_p4), [#allocation19], 4294967024  ;;  %s4837_s8 = sld [smem:[#allocation29_spill]]  ;;  %v3889_v0 = vmov 0.0   ;;  %vm3890_vm0 = vmmov 0   ;;  %v3402_v1 = vld [vmem:[#allocation8] sm:$0xff]   ;;  %v995_v29 = vlaneseq }
 0x179   : > { %3056 = vmatprep.subr.bf16.mxu1 %v3889_v0  ;;  %3048 = vmatprep.subr.bf16.mxu0 %v3889_v0  ;;  %s4838_s28 = sld [smem:[#allocation30_spill]]  ;;  %v3403_v2 = vld [vmem:[#allocation6] sm:$0xff]   ;;  %v3404_v3 = vld [vmem:[#allocation8 + $0x8] sm:$0xff]   ;;  %vm1018_vm1 = vcmask 261120   ;;  %v3405_v5 = vld [vmem:[#allocation6 + $0x8] sm:$0xff]   ;;  %vm1177_vm2 = vcmask 64512  }
 0x17a   : > { %3060 = vmatprep.mubr.msk.bf16.mxu1 %vm3890_vm0, %v3889_v0  ;;  %3052 = vmatprep.mubr.msk.bf16.mxu0 %vm3890_vm0, %v3889_v0  ;;  %s4782_s10 = smov 112   ;;  %s3892_s0 = smov 120   ;;  %v3406_v18 = vld [vmem:[#allocation9] sm:$0xff]   ;;  %v3407_v19 = vld [vmem:[#allocation9 + $0x8] sm:$0xff]   ;;  %v996_v30 = vshrl.u32 %v995_v29, 7  ;;  %v998_v31 = vand.u32 127, %v995_v29 }
 0x17b   : > { %3057 = vmatpush3.bf16.msra.mxu1 %v3402_v1  ;;  %3049 = vmatpush3.bf16.msra.mxu0 %v3403_v2  ;;  %s4780_s19 = smov 104   ;;  %v3894_v32 = vmov -1e+20   ;;  %vm1239_vm4 = vcmask 1043456   ;;  %s4779_s20 = smov 8   ;;  %vm1401_vm5 = vcmask 130112  }
 0x17c   : > { %3058 = vmatprep.subr.bf16.mxu1 %v3889_v0  ;;  %3050 = vmatprep.subr.bf16.mxu0 %v3889_v0  ;;  %vm999_vm3 = vcmp.ge.s32.totalorder %v996_v30, %v998_v31  ;;  %s4839_s1 = sld [smem:[#allocation37_spill]]  ;;  %s4777_s4 = smov 24   ;;  %vm1517_vm6 = vcmask 195712   ;;  %vm1633_vm7 = vcmask 261312   ;;  %vm2585_vm8 = vcmask 523264  }
 0x17d   : > { %v1000_v33 = vsel %vm999_vm3, 0.0, %v3894_v32  ;;  %s4841_s23 = sld [smem:[#allocation41_spill]]  ;;  %s4847_s18 = smov 16  }
 0x17e   : > { %p978_p2 = scmp.lt.s32.totalorder %s4837_s8, 1  ;;  %s4857_s14 = sld [smem:[#allocation53_spill]] }
 0x17f   : > { %3059 = vmatpush3.bf16.msra.mxu1 %v3404_v3  ;;  %3051 = vmatpush3.bf16.msra.mxu0 %v3405_v5  ;;  %p4858_p10 = scmp.ne.s32.totalorder %s4831_s30, 0 }
 0x180   : > { %s979_s26 = scalar_select %p978_p2, %s4837_s8, 1  ;;  %3072 = vmatprep.subr.bf16.mxu1 %v3889_v0  ;;  %3064 = vmatprep.subr.bf16.mxu0 %v3889_v0 }
 0x182   : > { %s4417_s13 = sshll.u32 %s979_s26, 3 }
 0x183   : > { %s981_s12 = scalar_lea.vmem %s4838_s28, %s4417_s13  ;;  %s4840_s28 = sld [smem:[#allocation32_spill]] }
 0x184   : > { %v4424_v4 = vld [vmem:[%s981_s12] sm:$0xff]  ;;  %s4778_s12 = smov 16  }
 0x185   : > { %v1001_v6 = vpack.c.bf16 %v4424_v4, %v4424_v4 }
 0x187   : > { %3061 = vmatmul.mubr.msk.bf16.vlgmr.msra.gmra.mrb[0].mxu1 %vm1018_vm1, %v1001_v6  ;;  %3053 = vmatmul.mubr.msk.bf16.vlgmr.msra.gmra.mrb[0].mxu0 %vm1018_vm1, %v1001_v6 }
 0x188   : > { %3074 = vmatprep.mubr.msk.bf16.mxu1 %vm3890_vm0, %v3889_v0  ;;  %3068 = vmatprep.mubr.msk.bf16.mxu0 %vm3890_vm0, %v3889_v0 }
 0x189   : > { %3065 = vmatpush3.bf16.msra.mxu0 %v3406_v18 }
 0x18a   : > { %3066 = vmatprep.subr.bf16.mxu0 %v3889_v0 }
 0x18d   : > { %3067 = vmatpush3.bf16.msra.mxu0 %v3407_v19 }
 0x18e   : > { %3078 = vmatprep.subr.bf16.mxu0 %v3889_v0 }
 0x190   : > { %3069 = vmatmul.mubr.msk.bf16.vlgmr.msra.gmra.mrb[4].mxu0 %vm1018_vm1, %v1001_v6 }
 0x191   : > { %3080 = vmatprep.mubr.msk.bf16.mxu0 %vm3890_vm0, %v3889_v0 }
 0x25a   : > { %v1113_v7 = vpop.f32.mrb[0].mxu1  ;;  %v1056_v10 = vpop.f32.mrb[0].mxu0 }
 0x25b   : > { %v1119_v8 = vpack.c.bf16 %v1113_v7, %v1113_v7  ;;  %v3062_v9 = vpop.f32.mrb[1].mxu1  ;;  %v3054_v12 = vpop.f32.mrb[1].mxu0  ;;  %v1062_v14 = vpack.c.bf16 %v1056_v10, %v1056_v10 }
 0x25c   : > { %v1116_v11 = vpop.f32.mrb[2].mxu1  ;;  %v1059_v16 = vpop.f32.mrb[2].mxu0 }
 0x25d   : > { %1405 = vrot.lane.b32.xlu1 %v1119_v8, %s4782_s10  ;;  %1288 = vrot.lane.b32.xlu0 %v1119_v8, %s3892_s0  ;;  %v3063_v13 = vpop.f32.mrb[3].mxu1  ;;  %v1182_v15 = vsel %vm1177_vm2, %v1119_v8, 0  ;;  %v3055_v17 = vpop.f32.mrb[3].mxu0 }
 0x25e   : > { %3073 = vmatpush3.bf16.xpose.msra.mxu1 %v1182_v15 }
 0x25f   : > { %3084 = vmatprep.subr.bf16.mxu1 %v3889_v0 }
 0x261   : > { %1403 = vrot.lane.b32.xlu1 %v1062_v14, %s4782_s10  ;;  %1285 = vrot.lane.b32.xlu0 %v1062_v14, %s3892_s0 }
 0x263   : > { %v1170_v40 = vpop.f32.mrb[4].mxu0 }
 0x264   : > { %v1176_v41 = vpack.c.bf16 %v1170_v40, %v1170_v40  ;;  %v3070_v42 = vpop.f32.mrb[5].mxu0 }
 0x265   : > { %1519 = vrot.lane.b32.xlu1 %v1062_v14, %s4780_s19  ;;  %1521 = vrot.lane.b32.xlu0 %v1119_v8, %s4780_s19  ;;  %v1173_v43 = vpop.f32.mrb[6].mxu0 }
 0x266   : > { %3075 = vmatmul.mubr.msk.bf16.vlgmr.msra.gmra.mrb[4].mxu1 %vm1177_vm2, %v1062_v14  ;;  %v3071_v44 = vpop.f32.mrb[7].mxu0  ;;  %v1241_v45 = vsel %vm1239_vm4, %v1176_v41, 0 }
 0x267   : > { %3086 = vmatprep.mubr.msk.bf16.mxu1 %vm3890_vm0, %v3889_v0  ;;  %3079 = vmatpush3.bf16.msra.mxu0 %v1241_v45 }
 0x268   : > { %3090 = vmatprep.subr.bf16.mxu0 %v3889_v0 }
 0x2cf   : > { %v1289_v20 = vpop.permute.xlu0 %1288  ;;  %v1406_v22 = vpop.permute.xlu1 %1405 }
 0x2d0   : > { %v1294_v21 = vsel %vm1177_vm2, %v1289_v20, 0  ;;  %v1411_v24 = vsel %vm1177_vm2, %v1406_v22, 0 }
 0x2d1   : > { %3085 = vmatpush3.bf16.xpose.msra.mxu1 %v1294_v21 }
 0x2d2   : > { %3096 = vmatprep.subr.bf16.mxu1 %v3889_v0 }
 0x2d3   : > { %v1286_v23 = vpop.permute.xlu0 %1285  ;;  %v1404_v26 = vpop.permute.xlu1 %1403 }
 0x2d7   : > { %v1522_v25 = vpop.permute.xlu0 %1521  ;;  %v1520_v28 = vpop.permute.xlu1 %1519 }
 0x2d8   : > { %3087 = vmatmul.mubr.msk.bf16.vlgmr.msra.gmra.mrb[8].mxu1 %vm1177_vm2, %v1286_v23  ;;  %v1527_v27 = vsel %vm1177_vm2, %v1522_v25, 0 }
 0x2d9   : > { %3097 = vmatpush3.bf16.xpose.msra.mxu1 %v1411_v24  ;;  %3098 = vmatprep.mubr.msk.bf16.mxu1 %vm3890_vm0, %v3889_v0 }
 0x2da   : > { %3108 = vmatprep.subr.bf16.mxu1 %v3889_v0 }
 0x2e0   : > { %3099 = vmatmul.mubr.msk.bf16.vlgmr.msra.gmra.mrb[12].mxu1 %vm1177_vm2, %v1404_v26 }
 0x2e1   : > { %3109 = vmatpush3.bf16.xpose.msra.mxu1 %v1527_v27  ;;  %3110 = vmatprep.mubr.msk.bf16.mxu1 %vm3890_vm0, %v3889_v0 }
 0x2e2   : > { %3120 = vmatprep.subr.bf16.mxu1 %v3889_v0 }
 0x2e8   : > { %3111 = vmatmul.mubr.msk.bf16.vlgmr.msra.gmra.mrb[16].mxu1 %vm1177_vm2, %v1520_v28 }
 0x2e9   : > { %3124 = vmatprep.mubr.msk.bf16.mxu1 %vm3890_vm0, %v3889_v0 }
 0x339   : > { %v1218_v34 = vpop.f32.mrb[4].mxu1 }
 0x33a   : > { %v1219_v35 = vadd.f32 %v1218_v34, %v1000_v33  ;;  %v3076_v36 = vpop.f32.mrb[5].mxu1 }
 0x33b   : > { %v1221_v37 = vpop.f32.mrb[6].mxu1 }
 0x33c   : > { %v3077_v38 = vpop.f32.mrb[7].mxu1  ;;  %v1224_v39 = vsel %vm1177_vm2, %v1219_v35, -inf }
 0x33d   : > { %1225 = vmax.xlane.f32.xlu0 %v1224_v39 }
 0x3ab   : > { %v1330_v46 = vpop.f32.mrb[8].mxu1 }
 0x3ac   : > { %v1331_v47 = vadd.f32 %v1330_v46, %v1000_v33  ;;  %v3088_v48 = vpop.f32.mrb[9].mxu1 }
 0x3ad   : > { %v1333_v49 = vpop.f32.mrb[10].mxu1 }
 0x3ae   : > { %v3089_v50 = vpop.f32.mrb[11].mxu1  ;;  %v1336_v51 = vsel %vm1177_vm2, %v1331_v47, -inf }
 0x3af   : > { %1337 = vmax.xlane.f32.xlu1 %v1336_v51 }
 0x3b3   : > { %v1447_v52 = vpop.f32.mrb[12].mxu1 }
 0x3b4   : > { %v1448_v53 = vadd.f32 %v1447_v52, %v1000_v33  ;;  %v3100_v54 = vpop.f32.mrb[13].mxu1  ;;  %v3408_v52 = vld [vmem:[%s4839_s1] sm:$0xff]  }
 0x3b5   : > { %v1450_v55 = vpop.f32.mrb[14].mxu1  ;;  %3121 = vmatpush3.bf16.msra.mxu1 %v3408_v52 }
 0x3b6   : > { %v3101_v56 = vpop.f32.mrb[15].mxu1  ;;  %v1453_v57 = vsel %vm1177_vm2, %v1448_v53, -inf  ;;  %3122 = vmatprep.subr.bf16.mxu1 %v3889_v0 }
 0x3b7   : > { %1454 = vmax.xlane.f32.xlu0 %v1453_v57 }
 0x3bb   : > { %v1563_v58 = vpop.f32.mrb[16].mxu1 }
 0x3bc   : > { %v1564_v59 = vadd.f32 %v1563_v58, %v1000_v33  ;;  %v3112_v60 = vpop.f32.mrb[17].mxu1 }
 0x3bd   : > { %v1566_v61 = vpop.f32.mrb[18].mxu1 }
 0x3be   : > { %v3113_v62 = vpop.f32.mrb[19].mxu1  ;;  %v1569_v63 = vsel %vm1177_vm2, %v1564_v59, -inf }
 0x3bf   : > { %1570 = vmax.xlane.f32.xlu0 %v1569_v63 }
 0x3ca   : > { %v1226_v1 = vpop.xlane.xlu0 %1225 }
 0x3cb   : > { %v1227_v2 = vsub.f32 %v1219_v35, %v1226_v1 }
 0x3cd   : > { %v1228_v3 = vmul.f32 1.442695, %v1227_v2 }
 0x3cf   : > { %3424 = vpow2.f32 %v1228_v3 }
 0x3d9   : > { %v3425_v5 = vpop.eup %3424 }
 0x3da   : > { %v1230_v6 = vsel %vm1177_vm2, %v3425_v5, 0.0 }
 0x3db   : > { %1231 = vadd.xlane.f32.xlu1 %v1230_v6 }
 0x3ec   : > { %1349 = vrot.lane.b32.xlu1 %v1176_v41, %s3892_s0 }
 0x43c   : > { %v1338_v7 = vpop.xlane.xlu1 %1337 }
 0x43d   : > { %v1339_v8 = vsub.f32 %v1331_v47, %v1338_v7 }
 0x43f   : > { %v1340_v9 = vmul.f32 1.442695, %v1339_v8 }
 0x441   : > { %3426 = vpow2.f32 %v1340_v9 }
 0x444   : > { %v1455_v10 = vpop.xlane.xlu0 %1454 }
 0x445   : > { %v1456_v11 = vsub.f32 %v1448_v53, %v1455_v10  ;;  %v3409_v53 = vld [vmem:[%s4839_s1 + $0x8] sm:$0xff]  }
 0x446   : > { %3123 = vmatpush3.bf16.msra.mxu1 %v3409_v53 }
 0x447   : > { %v1457_v12 = vmul.f32 1.442695, %v1456_v11  ;;  %3136 = vmatprep.subr.bf16.mxu1 %v3889_v0 }
 0x449   : > { %3428 = vpow2.f32 %v1457_v12 }
 0x44b   : > { %v3427_v13 = vpop.eup %3426 }
 0x44c   : > { %v1571_v14 = vpop.xlane.xlu0 %1570  ;;  %v1342_v15 = vsel %vm1177_vm2, %v3427_v13, 0.0 }
 0x44d   : > { %v1572_v16 = vsub.f32 %v1564_v59, %v1571_v14  ;;  %1343 = vadd.xlane.f32.xlu0 %v1342_v15 }
 0x44f   : > { %v1573_v17 = vmul.f32 1.442695, %v1572_v16 }
 0x451   : > { %3430 = vpow2.f32 %v1573_v17  ;;  %v3410_v17 = vld [vmem:[#allocation15] sm:$0xff]  }
 0x453   : > { %v3429_v18 = vpop.eup %3428 }
 0x454   : > { %v1459_v19 = vsel %vm1177_vm2, %v3429_v18, 0.0 }
 0x455   : > { %1460 = vadd.xlane.f32.xlu1 %v1459_v19 }
 0x45b   : > { %v3431_v20 = vpop.eup %3430 }
 0x45c   : > { %v1575_v21 = vsel %vm1177_vm2, %v3431_v20, 0.0 }
 0x45d   : > { %1576 = vadd.xlane.f32.xlu0 %v1575_v21  ;;  %v3412_v21 = vld [vmem:[%s4841_s23] sm:$0xff]  }
 0x466   : > { %1581 = vrot.lane.b32.xlu1 %v1176_v41, %s4780_s19  ;;  %s4843_s19 = smov 104  }
 0x468   : > { %v1232_v22 = vpop.xlane.xlu1 %1231 }
 0x469   : > { %3432 = vrcp.f32 %v1232_v22  ;;  %v3413_v22 = vld [vmem:[%s4841_s23 + $0x8] sm:$0xff]  }
 0x46c   : > { %v1350_v24 = vpop.permute.xlu1 %1349 }
 0x46d   : > { %v1355_v27 = vsel %vm1239_vm4, %v1350_v24, 0 }
 0x473   : > { %v3433_v23 = vpop.eup %3432  ;;  %1465 = vrot.lane.b32.xlu0 %v1176_v41, %s4782_s10  ;;  %s4842_s10 = smov 112  }
 0x474   : > { %v1234_v25 = vmul.f32 %v3433_v23, %v3425_v5  ;;  %v2938_v5 = vld [vmem:[#allocation11] ss:$0 sm:$0xff] }
 0x476   : > { %v1235_v26 = vpack.c.bf16 %v1234_v25, %v1234_v25 }
 0x478   : > { %3081 = vmatmul.mubr.msk.bf16.vlgmr.msra.gmra.mrb[8].mxu0 %vm1177_vm2, %v1235_v26 }
 0x479   : > { %3091 = vmatpush3.bf16.msra.mxu0 %v1355_v27  ;;  %3092 = vmatprep.mubr.msk.bf16.mxu0 %vm3890_vm0, %v3889_v0  ;;  %v2942_v27 = vld [vmem:[#allocation12] ss:$0 sm:$0xff] }
 0x47a   : > { %3102 = vmatprep.subr.bf16.mxu0 %v3889_v0 }
 0x4da   : > { %v1344_v28 = vpop.xlane.xlu0 %1343 }
 0x4db   : > { %3434 = vrcp.f32 %v1344_v28 }
 0x4e2   : > { %v1461_v29 = vpop.xlane.xlu1 %1460 }
 0x4e3   : > { %3436 = vrcp.f32 %v1461_v29  ;;  %v2943_v29 = vld [vmem:[#allocation14] ss:$0 sm:$0xff] }
 0x4e5   : > { %v3435_v30 = vpop.eup %3434 }
 0x4e6   : > { %v1346_v31 = vmul.f32 %v3435_v30, %v3427_v13  ;;  %v1582_v38 = vpop.permute.xlu1 %1581 }
 0x4e7   : > { %v1587_v40 = vsel %vm1239_vm4, %v1582_v38, 0 }
 0x4e8   : > { %v1347_v32 = vpack.c.bf16 %v1346_v31, %v1346_v31 }
 0x4ea   : > { %v1577_v33 = vpop.xlane.xlu0 %1576  ;;  %3093 = vmatmul.mubr.msk.bf16.vlgmr.msra.gmra.mrb[12].mxu0 %vm1177_vm2, %v1347_v32 }
 0x4eb   : > { %3438 = vrcp.f32 %v1577_v33  ;;  %3104 = vmatprep.mubr.msk.bf16.mxu0 %vm3890_vm0, %v3889_v0 }
 0x4ed   : > { %v3437_v34 = vpop.eup %3436 }
 0x4ee   : > { %v1463_v35 = vmul.f32 %v3437_v34, %v3429_v18  ;;  %v1466_v36 = vpop.permute.xlu0 %1465  ;;  %v3411_v18 = vld [vmem:[#allocation15 + $0x8] sm:$0xff]  }
 0x4ef   : > { %v1471_v37 = vsel %vm1239_vm4, %v1466_v36, 0 }
 0x4f0   : > { %3103 = vmatpush3.bf16.msra.mxu0 %v1471_v37  ;;  %v1464_v39 = vpack.c.bf16 %v1463_v35, %v1463_v35 }
 0x4f1   : > { %3114 = vmatprep.subr.bf16.mxu0 %v3889_v0 }
 0x4f3   : > { %3105 = vmatmul.mubr.msk.bf16.vlgmr.msra.gmra.mrb[16].mxu0 %vm1177_vm2, %v1464_v39 }
 0x4f4   : > { %3115 = vmatpush3.bf16.msra.mxu0 %v1587_v40  ;;  %3116 = vmatprep.mubr.msk.bf16.mxu0 %vm3890_vm0, %v3889_v0 }
 0x4f5   : > { %v3439_v41 = vpop.eup %3438  ;;  %3128 = vmatprep.subr.bf16.mxu0 %v3889_v0 }
 0x4f6   : > { %v1579_v42 = vmul.f32 %v3439_v41, %v3431_v20 }
 0x4f8   : > { %v1580_v43 = vpack.c.bf16 %v1579_v42, %v1579_v42 }
 0x4fb   : > { %3117 = vmatmul.mubr.msk.bf16.vlgmr.msra.gmra.mrb[20].mxu0 %vm1177_vm2, %v1580_v43 }
 0x4fc   : > { %3132 = vmatprep.mubr.msk.bf16.mxu0 %vm3890_vm0, %v3889_v0  ;;  %3129 = vmatpush3.bf16.msra.mxu0 %v3412_v21 }
 0x4fd   : > { %3130 = vmatprep.subr.bf16.mxu0 %v3889_v0 }
 0x500   : > { %3131 = vmatpush3.bf16.msra.mxu0 %v3413_v22 }
 0x501   : > { %3144 = vmatprep.subr.bf16.mxu0 %v3889_v0 }
 0x54b   : > { %v1277_v44 = vpop.f32.mrb[8].mxu0 }
 0x54c   : > { %1283 = vst.msk [vmem:[#allocation2] sm:$0xff] %vm1177_vm2, %v1277_v44  ;;  %v3082_v45 = vpop.f32.mrb[9].mxu0 }
 0x54d   : > { %v1280_v46 = vpop.f32.mrb[10].mxu0 }
 0x54e   : > { %v3083_v47 = vpop.f32.mrb[11].mxu0  ;;  %v3414_v46 = vld [vmem:[#allocation17] sm:$0xff]  }
 0x54f   : > { %v3415_v47 = vld [vmem:[#allocation17 + $0x8] sm:$0xff]  }
 0x5bd   : > { %v1391_v48 = vpop.f32.mrb[12].mxu0 }
 0x5be   : > { %1398 = vrot.lane.b32.xlu1 %v1391_v48, %s4779_s20  ;;  %v3094_v49 = vpop.f32.mrb[13].mxu0  ;;  %s4849_s20 = sld [smem:[#allocation47_spill]] }
 0x5bf   : > { %v1394_v50 = vpop.f32.mrb[14].mxu0 }
 0x5c0   : > { %v3095_v51 = vpop.f32.mrb[15].mxu0 }
 0x5c6   : > { %v1507_v54 = vpop.f32.mrb[16].mxu0 }
 0x5c7   : > { %1514 = vrot.lane.b32.xlu0 %v1507_v54, %s4778_s12  ;;  %v3106_v55 = vpop.f32.mrb[17].mxu0  ;;  %s4851_s12 = sld [smem:[#allocation45_spill]] }
 0x5c8   : > { %v1510_v56 = vpop.f32.mrb[18].mxu0 }
 0x5c9   : > { %v3107_v57 = vpop.f32.mrb[19].mxu0 }
 0x5ce   : > { %v1623_v58 = vpop.f32.mrb[20].mxu0 }
 0x5cf   : > { %1630 = vrot.lane.b32.xlu1 %v1623_v58, %s4777_s4  ;;  %v3118_v59 = vpop.f32.mrb[21].mxu0  ;;  %s989_s4 = scalar_lea.vmem %s4840_s28, %s4417_s13  ;;  %s4848_s28 = smov 24  }
 0x5d0   : > { %v1626_v60 = vpop.f32.mrb[22].mxu0  ;;  %v1735_v19 = vld [vmem:[%s989_s4] sm:$0xff]  ;;  %s4844_s4 = sld [smem:[#allocation31_spill]] }
 0x5d1   : > { %v3119_v61 = vpop.f32.mrb[23].mxu0  ;;  %v1738_v20 = vpack.c.bf16 %v1735_v19, %v1735_v19 }
 0x5d6   : > { %s985_s26 = scalar_lea.vmem %s4844_s4, %s4417_s13  ;;  %s4845_s13 = scalar_lea.vmem [#allocation3], %s4381_s5 }
 0x5d7   : > { %v1736_v48 = vld [vmem:[%s985_s26] sm:$0xff]  ;;  %s4853_s26 = sld [smem:[#allocation48_spill]]  ;;  %s4855_s4 = sld [smem:[#allocation51_spill]] }
 0x5d8   : > { %v1739_v49 = vpack.c.bf16 %v1736_v48, %v1736_v48  ;;  %v2953_v57 = vld [vmem:[%s4845_s13] ss:$0 sm:$0xff]  ;;  %s4852_s13 = sld [smem:[#allocation46_spill]] }
 0x630   : > { %v1399_v62 = vpop.permute.xlu1 %1398 }
 0x631   : > { %1402 = vst.msk [vmem:[#allocation2] sm:$0xff] %vm1401_vm5, %v1399_v62 }
 0x639   : > { %v1515_v63 = vpop.permute.xlu0 %1514 }
 0x63a   : > { %1518 = vst.msk [vmem:[#allocation2] sm:$0xff] %vm1517_vm6, %v1515_v63 }
 0x641   : > { %v1631_v1 = vpop.permute.xlu1 %1630 }
 0x642   : > { %1634 = vst.msk [vmem:[#allocation2] sm:$0xff] %vm1633_vm7, %v1631_v1 }
 0x649   : > { %v1635_v2 = vld [vmem:[#allocation2] sm:$0xff] }
 0x64a   : > { %v1636_v3 = vpack.c.bf16 %v1635_v2, %v1635_v2 }
 0x64c   : > { %3125 = vmatmul.mubr.msk.bf16.vlgmr.msra.gmra.mrb[20].mxu1 %vm1018_vm1, %v1636_v3 }
 0x64d   : > { %3140 = vmatprep.mubr.msk.bf16.mxu1 %vm3890_vm0, %v3889_v0  ;;  %3137 = vmatpush3.bf16.msra.mxu1 %v3410_v17 }
 0x64e   : > { %3138 = vmatprep.subr.bf16.mxu1 %v3889_v0 }
 0x651   : > { %3139 = vmatpush3.bf16.msra.mxu1 %v3411_v18 }
 0x652   : > { %3152 = vmatprep.subr.bf16.mxu1 %v3889_v0 }
 0x654   : > { %3141 = vmatmul.mubr.msk.bf16.vlgmr.msra.gmra.mrb[24].mxu1 %vm1018_vm1, %v1738_v20 }
 0x655   : > { %3154 = vmatprep.mubr.msk.bf16.mxu1 %vm3890_vm0, %v3889_v0 }
 0x71f   : > { %v1697_v6 = vpop.f32.mrb[20].mxu1 }
 0x720   : > { %v1698_v7 = vadd.f32 %v2938_v5, %v1697_v6  ;;  %v3126_v8 = vpop.f32.mrb[21].mxu1 }
 0x721   : > { %v1700_v9 = vpop.f32.mrb[22].mxu1 }
 0x722   : > { %v3127_v10 = vpop.f32.mrb[23].mxu1  ;;  %v1703_v11 = vsel %vm1018_vm1, %v1698_v7, 0.0 }
 0x723   : > { %1704 = vadd.xlane.f32.xlu0 %v1703_v11 }
 0x727   : > { %v1853_v34 = vpop.f32.mrb[24].mxu1 }
 0x728   : > { %v1859_v35 = vpack.c.bf16 %v1853_v34, %v1853_v34  ;;  %v3142_v36 = vpop.f32.mrb[25].mxu1 }
 0x729   : > { %v1856_v37 = vpop.f32.mrb[26].mxu1 }
 0x72a   : > { %v3143_v38 = vpop.f32.mrb[27].mxu1  ;;  %v1930_v39 = vsel %vm1177_vm2, %v1859_v35, 0 }
 0x72b   : > { %3153 = vmatpush3.bf16.xpose.msra.mxu1 %v1930_v39 }
 0x72c   : > { %3164 = vmatprep.subr.bf16.mxu1 %v3889_v0 }
 0x739   : > { %2035 = vrot.lane.b32.xlu0 %v1859_v35, %s3892_s0 }
 0x73d   : > { %2151 = vrot.lane.b32.xlu0 %v1859_v35, %s4842_s10 }
 0x741   : > { %2266 = vrot.lane.b32.xlu0 %v1859_v35, %s4843_s19 }
 0x7b0   : > { %v1705_v12 = vpop.xlane.xlu0 %1704 }
 0x7b1   : > { %v1707_v13 = vmul.f32 0.03125, %v1705_v12 }
 0x7b3   : > { %v1708_v14 = vsub.f32 %v1698_v7, %v1707_v13 }
 0x7b4   : > { %v2036_v40 = vpop.permute.xlu0 %2035 }
 0x7b5   : > { %v1709_v15 = vmul.f32 %v1708_v14, %v1708_v14  ;;  %v2041_v43 = vsel %vm1177_vm2, %v2036_v40, 0 }
 0x7b7   : > { %v1710_v16 = vsel %vm1018_vm1, %v1709_v15, 0.0 }
 0x7b8   : > { %1711 = vadd.xlane.f32.xlu1 %v1710_v16  ;;  %v2152_v50 = vpop.permute.xlu0 %2151 }
 0x7b9   : > { %v2157_v52 = vsel %vm1177_vm2, %v2152_v50, 0 }
 0x7bc   : > { %v2267_v53 = vpop.permute.xlu0 %2266 }
 0x7bd   : > { %v2272_v55 = vsel %vm1177_vm2, %v2267_v53, 0 }
 0x845   : > { %v1712_v23 = vpop.xlane.xlu1 %1711 }
 0x846   : > { %v1713_v24 = vmul.f32 0.03125, %v1712_v23 }
 0x848   : > { %v1714_v25 = vadd.f32 1e-05, %v1713_v24 }
 0x84a   : > { %3440 = vrsqrt.f32 %v1714_v25 }
 0x854   : > { %v3441_v26 = vpop.eup %3440 }
 0x855   : > { %v1716_v28 = vmul.f32 %v3441_v26, %v1708_v14 }
 0x857   : > { %v1724_v30 = vmul.f32 %v2942_v27, %v1716_v28 }
 0x859   : > { %v1732_v31 = vadd.f32 %v2943_v29, %v1724_v30 }
 0x85b   : > { %v4537_v32 = vadd.f32 %v1732_v31, %v4424_v4 }
 0x85d   : > { %v1737_v33 = vpack.c.bf16 %v4537_v32, %v4537_v32 }
 0x85f   : > { %3133 = vmatmul.mubr.msk.bf16.vlgmr.msra.gmra.mrb[24].mxu0 %vm1018_vm1, %v1737_v33 }
 0x860   : > { %3148 = vmatprep.mubr.msk.bf16.mxu0 %vm3890_vm0, %v3889_v0  ;;  %3145 = vmatpush3.bf16.msra.mxu0 %v3414_v46 }
 0x861   : > { %3146 = vmatprep.subr.bf16.mxu0 %v3889_v0 }
 0x864   : > { %3147 = vmatpush3.bf16.msra.mxu0 %v3415_v47 }
 0x865   : > { %3158 = vmatprep.subr.bf16.mxu0 %v3889_v0 }
 0x867   : > { %3149 = vmatmul.mubr.msk.bf16.vlgmr.msra.gmra.mrb[28].mxu0 %vm1018_vm1, %v1739_v49 }
 0x868   : > { %3160 = vmatprep.mubr.msk.bf16.mxu0 %vm3890_vm0, %v3889_v0 }
 0x932   : > { %v1793_v4 = vpop.f32.mrb[24].mxu0 }
 0x933   : > { %v1799_v41 = vpack.c.bf16 %v1793_v4, %v1793_v4  ;;  %v3134_v42 = vpop.f32.mrb[25].mxu0 }
 0x934   : > { %v1796_v44 = vpop.f32.mrb[26].mxu0 }
 0x935   : > { %2032 = vrot.lane.b32.xlu1 %v1799_v41, %s3892_s0  ;;  %v3135_v45 = vpop.f32.mrb[27].mxu0  ;;  %3155 = vmatmul.mubr.msk.bf16.vlgmr.msra.gmra.mrb[28].mxu1 %vm1177_vm2, %v1799_v41 }
 0x936   : > { %3165 = vmatpush3.bf16.xpose.msra.mxu1 %v2041_v43  ;;  %3166 = vmatprep.mubr.msk.bf16.mxu1 %vm3890_vm0, %v3889_v0 }
 0x937   : > { %3176 = vmatprep.subr.bf16.mxu1 %v3889_v0 }
 0x939   : > { %2149 = vrot.lane.b32.xlu1 %v1799_v41, %s4842_s10 }
 0x93a   : > { %v1913_v1 = vpop.f32.mrb[28].mxu0 }
 0x93b   : > { %v4582_v2 = vpack.c.bf16 %v1913_v1, %v1913_v1  ;;  %v3150_v3 = vpop.f32.mrb[29].mxu0 }
 0x93c   : > { %v1916_v5 = vpop.f32.mrb[30].mxu0 }
 0x93d   : > { %2264 = vrot.lane.b32.xlu1 %v1799_v41, %s4843_s19  ;;  %v3151_v6 = vpop.f32.mrb[31].mxu0  ;;  %v1988_v7 = vsel %vm1239_vm4, %v4582_v2, 0 }
 0x93e   : > { %3159 = vmatpush3.bf16.msra.mxu0 %v1988_v7 }
 0x93f   : > { %3170 = vmatprep.subr.bf16.mxu0 %v3889_v0 }
 0x9a7   : > { %v2033_v51 = vpop.permute.xlu1 %2032 }
 0x9a8   : > { %3167 = vmatmul.mubr.msk.bf16.vlgmr.msra.gmra.mrb[32].mxu1 %vm1177_vm2, %v2033_v51 }
 0x9a9   : > { %3177 = vmatpush3.bf16.xpose.msra.mxu1 %v2157_v52  ;;  %3178 = vmatprep.mubr.msk.bf16.mxu1 %vm3890_vm0, %v3889_v0 }
 0x9aa   : > { %3188 = vmatprep.subr.bf16.mxu1 %v3889_v0 }
 0x9ab   : > { %v2150_v54 = vpop.permute.xlu1 %2149 }
 0x9af   : > { %v2265_v56 = vpop.permute.xlu1 %2264 }
 0x9b0   : > { %3179 = vmatmul.mubr.msk.bf16.vlgmr.msra.gmra.mrb[36].mxu1 %vm1177_vm2, %v2150_v54 }
 0x9b1   : > { %3189 = vmatpush3.bf16.xpose.msra.mxu1 %v2272_v55  ;;  %3190 = vmatprep.mubr.msk.bf16.mxu1 %vm3890_vm0, %v3889_v0 }
 0x9b2   : > { %3200 = vmatprep.subr.bf16.mxu1 %v3889_v0 }
 0x9b8   : > { %3191 = vmatmul.mubr.msk.bf16.vlgmr.msra.gmra.mrb[40].mxu1 %vm1177_vm2, %v2265_v56 }
 0x9b9   : > { %3204 = vmatprep.mubr.msk.bf16.mxu1 %vm3890_vm0, %v3889_v0 }
 0xa08   : > { %v1966_v58 = vpop.f32.mrb[28].mxu1 }
 0xa09   : > { %v1967_v59 = vadd.f32 %v2953_v57, %v1966_v58  ;;  %v3156_v60 = vpop.f32.mrb[29].mxu1 }
 0xa0a   : > { %v1969_v61 = vpop.f32.mrb[30].mxu1 }
 0xa0b   : > { %v3157_v62 = vpop.f32.mrb[31].mxu1  ;;  %v1972_v63 = vsel %vm1177_vm2, %v1967_v59, -inf }
 0xa0c   : > { %1973 = vmax.xlane.f32.xlu0 %v1972_v63 }
 0xa7b   : > { %v2077_v8 = vpop.f32.mrb[32].mxu1 }
 0xa7c   : > { %v2078_v9 = vadd.f32 %v2953_v57, %v2077_v8  ;;  %v3168_v10 = vpop.f32.mrb[33].mxu1 }
 0xa7d   : > { %v2080_v11 = vpop.f32.mrb[34].mxu1 }
 0xa7e   : > { %v3169_v12 = vpop.f32.mrb[35].mxu1  ;;  %v2083_v13 = vsel %vm1177_vm2, %v2078_v9, -inf }
 0xa7f   : > { %2084 = vmax.xlane.f32.xlu1 %v2083_v13 }
 0xa83   : > { %v2193_v14 = vpop.f32.mrb[36].mxu1 }
 0xa84   : > { %v2194_v15 = vadd.f32 %v2953_v57, %v2193_v14  ;;  %v3180_v16 = vpop.f32.mrb[37].mxu1  ;;  %v3416_v14 = vld [vmem:[#allocation18] sm:$0xff]  }
 0xa85   : > { %v2196_v17 = vpop.f32.mrb[38].mxu1  ;;  %3201 = vmatpush3.bf16.msra.mxu1 %v3416_v14 }
 0xa86   : > { %v3181_v18 = vpop.f32.mrb[39].mxu1  ;;  %v2199_v19 = vsel %vm1177_vm2, %v2194_v15, -inf  ;;  %3202 = vmatprep.subr.bf16.mxu1 %v3889_v0 }
 0xa87   : > { %2200 = vmax.xlane.f32.xlu0 %v2199_v19 }
 0xa8b   : > { %v2308_v20 = vpop.f32.mrb[40].mxu1 }
 0xa8c   : > { %v2309_v21 = vadd.f32 %v2953_v57, %v2308_v20  ;;  %v3192_v22 = vpop.f32.mrb[41].mxu1 }
 0xa8d   : > { %v2311_v23 = vpop.f32.mrb[42].mxu1 }
 0xa8e   : > { %v3193_v24 = vpop.f32.mrb[43].mxu1  ;;  %v2314_v25 = vsel %vm1177_vm2, %v2309_v21, -inf }
 0xa8f   : > { %2315 = vmax.xlane.f32.xlu0 %v2314_v25 }
 0xa99   : > { %v1974_v26 = vpop.xlane.xlu0 %1973 }
 0xa9a   : > { %v1975_v27 = vsub.f32 %v1967_v59, %v1974_v26 }
 0xa9c   : > { %v1976_v28 = vmul.f32 1.442695, %v1975_v27 }
 0xa9e   : > { %3442 = vpow2.f32 %v1976_v28 }
 0xaa8   : > { %v3443_v29 = vpop.eup %3442 }
 0xaa9   : > { %v1978_v30 = vsel %vm1177_vm2, %v3443_v29, 0.0 }
 0xaaa   : > { %1979 = vadd.xlane.f32.xlu1 %v1978_v30 }
 0xabb   : > { %2096 = vrot.lane.b32.xlu1 %v4582_v2, %s3892_s0  ;;  %s4846_s0 = smov 8  }
 0xb0c   : > { %v2085_v31 = vpop.xlane.xlu1 %2084 }
 0xb0d   : > { %v2086_v33 = vsub.f32 %v2078_v9, %v2085_v31 }
 0xb0f   : > { %v2087_v34 = vmul.f32 1.442695, %v2086_v33 }
 0xb11   : > { %3444 = vpow2.f32 %v2087_v34 }
 0xb14   : > { %v2201_v35 = vpop.xlane.xlu0 %2200 }
 0xb15   : > { %v2202_v36 = vsub.f32 %v2194_v15, %v2201_v35  ;;  %v3417_v15 = vld [vmem:[#allocation18 + $0x8] sm:$0xff]  }
 0xb16   : > { %3203 = vmatpush3.bf16.msra.mxu1 %v3417_v15 }
 0xb17   : > { %v2203_v37 = vmul.f32 1.442695, %v2202_v36  ;;  %3216 = vmatprep.subr.bf16.mxu1 %v3889_v0 }
 0xb19   : > { %3446 = vpow2.f32 %v2203_v37 }
 0xb1b   : > { %v3445_v38 = vpop.eup %3444 }
 0xb1c   : > { %v2316_v39 = vpop.xlane.xlu0 %2315  ;;  %v2089_v4 = vsel %vm1177_vm2, %v3445_v38, 0.0 }
 0xb1d   : > { %v2317_v40 = vsub.f32 %v2309_v21, %v2316_v39  ;;  %2090 = vadd.xlane.f32.xlu0 %v2089_v4 }
 0xb1f   : > { %v2318_v41 = vmul.f32 1.442695, %v2317_v40 }
 0xb21   : > { %3448 = vpow2.f32 %v2318_v41  ;;  %v3418_v41 = vld [vmem:[%s4849_s20] sm:$0xff]  }
 0xb23   : > { %v3447_v42 = vpop.eup %3446 }
 0xb24   : > { %v2205_v43 = vsel %vm1177_vm2, %v3447_v42, 0.0 }
 0xb25   : > { %2206 = vadd.xlane.f32.xlu1 %v2205_v43 }
 0xb2b   : > { %v3449_v44 = vpop.eup %3448 }
 0xb2c   : > { %v2320_v45 = vsel %vm1177_vm2, %v3449_v44, 0.0 }
 0xb2d   : > { %2321 = vadd.xlane.f32.xlu0 %v2320_v45 }
 0xb36   : > { %2326 = vrot.lane.b32.xlu1 %v4582_v2, %s4843_s19  ;;  %s2661_s19 = scalar_lea.sflag [#allocation5], %s4381_s5 }
 0xb37   : > { %v1980_v46 = vpop.xlane.xlu1 %1979 }
 0xb38   : > { %3450 = vrcp.f32 %v1980_v46 }
 0xb3b   : > { %v2097_v48 = vpop.permute.xlu1 %2096 }
 0xb3c   : > { %v2102_v51 = vsel %vm1239_vm4, %v2097_v48, 0 }
 0xb42   : > { %v3451_v47 = vpop.eup %3450 }
 0xb43   : > { %v1982_v49 = vmul.f32 %v3451_v47, %v3443_v29  ;;  %2211 = vrot.lane.b32.xlu0 %v4582_v2, %s4842_s10  ;;  %v2962_v29 = vld [vmem:[#allocation20] ss:$0 sm:$0xff]  ;;  %s2917_s10 = sshll.u32 %s4381_s5, 3 }
 0xb45   : > { %v1983_v50 = vpack.c.bf16 %v1982_v49, %v1982_v49  ;;  %v2966_v49 = vld [vmem:[%s4851_s12] ss:$0 sm:$0xff] }
 0xb47   : > { %3161 = vmatmul.mubr.msk.bf16.vlgmr.msra.gmra.mrb[32].mxu0 %vm1177_vm2, %v1983_v50 }
 0xb48   : > { %3171 = vmatpush3.bf16.msra.mxu0 %v2102_v51  ;;  %3172 = vmatprep.mubr.msk.bf16.mxu0 %vm3890_vm0, %v3889_v0  ;;  %v2967_v51 = vld [vmem:[%s4852_s13] ss:$0 sm:$0xff] }
 0xb49   : > { %3182 = vmatprep.subr.bf16.mxu0 %v3889_v0 }
 0xbaa   : > { %v2091_v52 = vpop.xlane.xlu0 %2090 }
 0xbab   : > { %3452 = vrcp.f32 %v2091_v52 }
 0xbb2   : > { %v2207_v53 = vpop.xlane.xlu1 %2206 }
 0xbb3   : > { %3454 = vrcp.f32 %v2207_v53 }
 0xbb5   : > { %v3453_v54 = vpop.eup %3452 }
 0xbb6   : > { %v2093_v55 = vmul.f32 %v3453_v54, %v3445_v38  ;;  %v2327_v62 = vpop.permute.xlu1 %2326 }
 0xbb7   : > { %v2332_v1 = vsel %vm1239_vm4, %v2327_v62, 0 }
 0xbb8   : > { %v2094_v56 = vpack.c.bf16 %v2093_v55, %v2093_v55 }
 0xbba   : > { %v2322_v57 = vpop.xlane.xlu0 %2321  ;;  %3173 = vmatmul.mubr.msk.bf16.vlgmr.msra.gmra.mrb[36].mxu0 %vm1177_vm2, %v2094_v56 }
 0xbbb   : > { %3456 = vrcp.f32 %v2322_v57  ;;  %3184 = vmatprep.mubr.msk.bf16.mxu0 %vm3890_vm0, %v3889_v0 }
 0xbbd   : > { %v3455_v58 = vpop.eup %3454 }
 0xbbe   : > { %v2209_v59 = vmul.f32 %v3455_v58, %v3447_v42  ;;  %v2212_v60 = vpop.permute.xlu0 %2211  ;;  %v3419_v42 = vld [vmem:[%s4849_s20 + $0x8] sm:$0xff]   ;;  %v2968_v58 = vld [vmem:[%s4853_s26] ss:$0 sm:$0xff] }
 0xbbf   : > { %v2217_v61 = vsel %vm1239_vm4, %v2212_v60, 0 }
 0xbc0   : > { %3183 = vmatpush3.bf16.msra.mxu0 %v2217_v61  ;;  %v2210_v63 = vpack.c.bf16 %v2209_v59, %v2209_v59 }
 0xbc1   : > { %3194 = vmatprep.subr.bf16.mxu0 %v3889_v0 }
 0xbc3   : > { %3185 = vmatmul.mubr.msk.bf16.vlgmr.msra.gmra.mrb[40].mxu0 %vm1177_vm2, %v2210_v63 }
 0xbc4   : > { %3195 = vmatpush3.bf16.msra.mxu0 %v2332_v1  ;;  %3196 = vmatprep.mubr.msk.bf16.mxu0 %vm3890_vm0, %v3889_v0 }
 0xbc5   : > { %v3457_v2 = vpop.eup %3456  ;;  %3208 = vmatprep.subr.bf16.mxu0 %v3889_v0 }
 0xbc6   : > { %v2324_v3 = vmul.f32 %v3457_v2, %v3449_v44 }
 0xbc8   : > { %v2325_v5 = vpack.c.bf16 %v2324_v3, %v2324_v3 }
 0xbcb   : > { %3197 = vmatmul.mubr.msk.bf16.vlgmr.msra.gmra.mrb[44].mxu0 %vm1177_vm2, %v2325_v5 }
 0xbcc   : > { %3212 = vmatprep.mubr.msk.bf16.mxu0 %vm3890_vm0, %v3889_v0  ;;  %3209 = vmatpush3.bf16.msra.mxu0 %v3418_v41 }
 0xbcd   : > { %3210 = vmatprep.subr.bf16.mxu0 %v3889_v0 }
 0xbd0   : > { %3211 = vmatpush3.bf16.msra.mxu0 %v3419_v42 }
 0xc1a   : > { %v2024_v6 = vpop.f32.mrb[32].mxu0 }
 0xc1b   : > { %2030 = vst.msk [vmem:[#allocation2] sm:$0xff] %vm1177_vm2, %v2024_v6  ;;  %v3162_v7 = vpop.f32.mrb[33].mxu0 }
 0xc1c   : > { %v2027_v8 = vpop.f32.mrb[34].mxu0 }
 0xc1d   : > { %v3163_v9 = vpop.f32.mrb[35].mxu0 }
 0xc8d   : > { %v2138_v10 = vpop.f32.mrb[36].mxu0 }
 0xc8e   : > { %2145 = vrot.lane.b32.xlu1 %v2138_v10, %s4846_s0  ;;  %v3174_v11 = vpop.f32.mrb[37].mxu0  ;;  %s4850_s0 = sld [smem:[#allocation49_spill]] }
 0xc8f   : > { %v2141_v12 = vpop.f32.mrb[38].mxu0 }
 0xc90   : > { %v3175_v13 = vpop.f32.mrb[39].mxu0 }
 0xc94   : > { %v3420_v43 = vld [vmem:[%s4850_s0] sm:$0xff]   ;;  %v3421_v44 = vld [vmem:[%s4850_s0 + $0x8] sm:$0xff]   ;;  %v3422_v56 = vld [vmem:[%s4850_s0 + $0x10] sm:$0xff]  }
 0xc95   : > { %v3423_v57 = vld [vmem:[%s4850_s0 + $0x18] sm:$0xff]   ;;  %s977_s0 = scalar_lea.vmem [#allocation21], %s2917_s10 }
 0xc96   : > { %v2253_v16 = vpop.f32.mrb[40].mxu0  ;;  %s2675_s1 = sshll.u32 %s977_s0, 4  ;;  %s4683_s1 = int_to_ptr.vmem [resolvable:$true] %s2675_s1 }
 0xc97   : > { %2260 = vrot.lane.b32.xlu0 %v2253_v16, %s4847_s18  ;;  %v3186_v17 = vpop.f32.mrb[41].mxu0  ;;  %s4856_s18 = sld [smem:[#allocation52_spill]]  ;;  %s3772_s12 = scalar_lea.vmem %s4683_s1, 128 }
 0xc98   : > { %v2256_v18 = vpop.f32.mrb[42].mxu0  ;;  %p3773_p9 = scmp.ne.s32.totalorder %s4683_s1, %s3772_s12 }
 0xc99   : > { %v3187_v19 = vpop.f32.mrb[43].mxu0  ;;  %v2978_v18 = vld [vmem:[%s4855_s4] ss:$0 sm:$0xff] }
 0xc9a   : > { %p3774_p1 = pnand %p3773_p9, %p4858_p10 }
 0xc9c   : > { %p3775_p0 = pneg %p3774_p1 }
 0xc9e   : > { %v2368_v20 = vpop.f32.mrb[44].mxu0 }
 0xc9f   : > { %2375 = vrot.lane.b32.xlu1 %v2368_v20, %s4848_s28  ;;  %v3198_v21 = vpop.f32.mrb[45].mxu0  ;;  %s4854_s28 = sld [smem:[#allocation50_spill]]  ;;  %v2979_v20 = vld [vmem:[%s4856_s18] ss:$0 sm:$0xff] }
 0xca0   : > { %v2371_v22 = vpop.f32.mrb[46].mxu0 }
 0xca1   : > { %v3199_v23 = vpop.f32.mrb[47].mxu0 }
 0xd00   : > { %v2146_v24 = vpop.permute.xlu1 %2145 }
 0xd01   : > { %2148 = vst.msk [vmem:[#allocation2] sm:$0xff] %vm1401_vm5, %v2146_v24 }
 0xd09   : > { %v2261_v25 = vpop.permute.xlu0 %2260 }
 0xd0a   : > { %2263 = vst.msk [vmem:[#allocation2] sm:$0xff] %vm1517_vm6, %v2261_v25 }
 0xd11   : > { %v2376_v26 = vpop.permute.xlu1 %2375 }
 0xd12   : > { %2378 = vst.msk [vmem:[#allocation2] sm:$0xff] %vm1633_vm7, %v2376_v26 }
 0xd19   : > { %v2379_v27 = vld [vmem:[#allocation2] sm:$0xff] }
 0xd1a   : > { %v2380_v28 = vpack.c.bf16 %v2379_v27, %v2379_v27 }
 0xd1c   : > { %3205 = vmatmul.mubr.msk.bf16.vlgmr.msra.gmra.mrb[44].mxu1 %vm1018_vm1, %v2380_v28 }
 0xd1d   : > { %3224 = vmatprep.mubr.msk.bf16.mxu1 %vm3890_vm0, %v3889_v0  ;;  %3217 = vmatpush3.bf16.msra.mxu1 %v3420_v43 }
 0xd1e   : > { %3218 = vmatprep.subr.bf16.mxu1 %v3889_v0 }
 0xd21   : > { %3219 = vmatpush3.bf16.msra.mxu1 %v3421_v44 }
 0xd22   : > { %3220 = vmatprep.subr.bf16.mxu1 %v3889_v0 }
 0xd25   : > { %3221 = vmatpush3.bf16.msra.mxu1 %v3422_v56 }
 0xd26   : > { %3222 = vmatprep.subr.bf16.mxu1 %v3889_v0  ;;  %v2972_v0 = vld [vmem:[%s4854_s28] ss:$0 sm:$0xff]  ;;  %s2981_s28 = sshll.u32 %s4837_s8, 7  ;;  %s3898_s8 = smov [#allocation21]  }
 0xd27   : > { %s4681_s15 = scalar_lea.hbm %s4857_s14, %s2981_s28  ;;  %s3776_s10 = sshll.u32 %s3898_s8, 4  ;;  %s3777_s10 = int_to_ptr.vmem [resolvable:$false] %s3776_s10 }
 0xd28   : > { %s3778_s4 = scalar_lea.vmem %s3777_s10, 256  ;;  %p3779_p7 = scmp.lt.s32.totalorder %s4683_s1, %s3777_s10 }
 0xd29   : > { %3223 = vmatpush3.bf16.msra.mxu1 %v3423_v57  ;;  %p3780_p5 = scmp.lt.s32.totalorder %s3778_s4, %s3772_s12 }
 0xd2b   : > { %p3781_p8 = por %p3780_p5, %p3779_p7 }
 0xd2d   : > { %p3782_p3 = pnand %p3781_p8, %p3775_p0 }
 0xdef   : > { %v2441_v30 = vpop.f32.mrb[44].mxu1 }
 0xdf0   : > { %v2442_v31 = vadd.f32 %v2962_v29, %v2441_v30  ;;  %v3206_v33 = vpop.f32.mrb[45].mxu1 }
 0xdf1   : > { %v2444_v34 = vpop.f32.mrb[46].mxu1 }
 0xdf2   : > { %v3207_v35 = vpop.f32.mrb[47].mxu1  ;;  %v2447_v36 = vsel %vm1018_vm1, %v2442_v31, 0.0 }
 0xdf3   : > { %2448 = vadd.xlane.f32.xlu0 %v2447_v36 }
 0xe80   : > { %v2449_v37 = vpop.xlane.xlu0 %2448 }
 0xe81   : > { %v2450_v38 = vmul.f32 0.03125, %v2449_v37 }
 0xe83   : > { %v2451_v39 = vsub.f32 %v2442_v31, %v2450_v38 }
 0xe85   : > { %v2452_v4 = vmul.f32 %v2451_v39, %v2451_v39 }
 0xe87   : > { %v2453_v40 = vsel %vm1018_vm1, %v2452_v4, 0.0 }
 0xe88   : > { %2454 = vadd.xlane.f32.xlu1 %v2453_v40 }
 0xf15   : > { %v2455_v45 = vpop.xlane.xlu1 %2454 }
 0xf16   : > { %v2456_v46 = vmul.f32 0.03125, %v2455_v45 }
 0xf18   : > { %v2457_v47 = vadd.f32 1e-05, %v2456_v46 }
 0xf1a   : > { %3458 = vrsqrt.f32 %v2457_v47 }
 0xf24   : > { %v3459_v48 = vpop.eup %3458 }
 0xf25   : > { %v2459_v50 = vmul.f32 %v3459_v48, %v2451_v39 }
 0xf27   : > { %v2467_v52 = vmul.f32 %v2966_v49, %v2459_v50 }
 0xf29   : > { %v2475_v53 = vadd.f32 %v2967_v51, %v2467_v52 }
 0xf2b   : > { %v2476_v54 = vadd.f32 %v2475_v53, %v4537_v32 }
 0xf2d   : > { %v2477_v55 = vpack.c.bf16 %v2476_v54, %v2476_v54 }
 0xf2f   : > { %3213 = vmatmul.mubr.msk.bf16.vlgmr.msra.gmra.mrb[48].mxu0 %vm1018_vm1, %v2477_v55 }
0x1002   : > { %v2538_v32 = vpop.f32.mrb[48].mxu0 }
0x1003   : > { %v2539_v59 = vadd.f32 %v2968_v58, %v2538_v32  ;;  %v3214_v60 = vpop.f32.mrb[49].mxu0 }
0x1004   : > { %v2541_v61 = vpop.f32.mrb[50].mxu0 }
0x1005   : > { %v2544_v62 = vmax.f32 %v2539_v59, 0.0  ;;  %v3215_v63 = vpop.f32.mrb[51].mxu0 }
0x1007   : > { %v2545_v1 = vpack.c.bf16 %v2544_v62, %v2544_v62 }
0x1009   : > { %3225 = vmatmul.mubr.msk.bf16.vlgmr.msra.gmra.mrb[48].mxu1 %vm2585_vm8, %v2545_v1 }
0x10dc   : > { %v2623_v2 = vpop.f32.mrb[48].mxu1 }
0x10dd   : > { %v2624_v3 = vadd.f32 %v2972_v0, %v2623_v2  ;;  %v3226_v5 = vpop.f32.mrb[49].mxu1 }
0x10de   : > { %v2626_v6 = vpop.f32.mrb[50].mxu1 }
0x10df   : > { %v3227_v7 = vpop.f32.mrb[51].mxu1  ;;  %v2629_v8 = vsel %vm1018_vm1, %v2624_v3, 0.0 }
0x10e0   : > { %2630 = vadd.xlane.f32.xlu0 %v2629_v8 }
0x116d   : > { %v2631_v9 = vpop.xlane.xlu0 %2630 }
0x116e   : > { %v2632_v10 = vmul.f32 0.03125, %v2631_v9 }
0x1170   : > { %v2633_v11 = vsub.f32 %v2624_v3, %v2632_v10 }
0x1172   : > { %v2634_v12 = vmul.f32 %v2633_v11, %v2633_v11 }
0x1174   : > { %v2635_v13 = vsel %vm1018_vm1, %v2634_v12, 0.0 }
0x1175   : > { %2636 = vadd.xlane.f32.xlu0 %v2635_v13 }
0x1202   : > { %v2637_v14 = vpop.xlane.xlu0 %2636 }
0x1203   : > { %v2638_v15 = vmul.f32 0.03125, %v2637_v14 }
0x1205   : > { %v2639_v16 = vadd.f32 1e-05, %v2638_v15 }
0x1207   : > { %3460 = vrsqrt.f32 %v2639_v16 }
0x1211   : > { %v3461_v17 = vpop.eup %3460 }
0x1212   : > { %v2641_v19 = vmul.f32 %v3461_v17, %v2633_v11 }
0x1214   : > { %v2649_v21 = vmul.f32 %v2978_v18, %v2641_v19 }
0x1216   : > { %v2657_v22 = vadd.f32 %v2979_v20, %v2649_v21 }
0x1218   : > { %v2658_v23 = vadd.f32 %v2657_v22, %v2476_v54 }
0x121a   : > { %2659 = vst.msk [vmem:[%s977_s0] sm:$0xff] %vm1018_vm1, %v2658_v23 }
0x121b   : > { %3785 = shalt.err (!%p3782_p3)
}
0x121c   : > { %s3786_s11 = scalar_lea.hbm %s4681_s15, 128  ;;  %s3790_s0 = scalar_lea.hbm %s4857_s14, 256 }
0x121d   : > { %p3787_p11 = scmp.ne.s32.totalorder %s4681_s15, %s3786_s11  ;;  %p3791_p12 = scmp.lt.u32.totalorder %s4681_s15, %s4857_s14 }
0x121e   : > { %p3792_p4 = scmp.lt.u32.totalorder %s3790_s0, %s3786_s11  ;;  %p3794_p9 = scmp.lt.u32.totalorder %s3786_s11, %s4681_s15 }
0x121f   : > { %p3788_p6 = pnand %p3787_p11, %p4858_p10 }
0x1220   : > { %p3793_p2 = por %p3792_p4, %p3791_p12 }
0x1221   : > { %p3789_p13 = pneg %p3788_p6 }
0x1222   : > { %p3795_p1 = por %p3794_p9, %p3793_p2 }
0x1224   : > { %p3796_p0 = pnand %p3795_p1, %p3789_p13 }
0x1226   : > { %3799 = shalt.err (!%p3796_p0)
}
0x1227   : > { %3270 = dma.vmem_to_hbm [thread:$0]  (%p4858_p10), %s4683_s1, 128, %s4681_s15, %s2661_s19  }
0x1228 PF: > { %s2687_s18 = sand.u32 1, %s3854_s29   ;;  %p4859_p7 = scmp.ne.s32.totalorder %s4832_s25, 0 }
0x1229   : > { %p4860_p5 = scmp.ge.s32.totalorder %s3874_s3, 2  ;;  %s2688_s28 = scalar_lea.sflag [#allocation5], %s2687_s18 }
0x122b   : > { %p3308_p8 = pnand %p4860_p5, %p4859_p7 }
0x122d   : > { %3849 = dma.done.wait (!%p3308_p8), %s2688_s28, 128  }
0x122e   : > { %3851 = vsyncadd (!%p3308_p8), %s2688_s28, 4294967168  ;;  %s46_s3 = sadd.s32 1, %s3874_s3   ;;  %s4861_s29 = smov %s3858_s2 }
0x122f   : > { %p43_p3 = scmp.ge.s32.totalorder %s46_s3, 4   ;;  %s4862_s2 = smov %s3862_s6 }
0x1230   : > { %s4863_s6 = smov %s4331_s27  ;;  %s4864_s30 = smov %s3870_s7 }
0x1231   : > { %s4865_s7 = smov %s4867_s22  ;;  %45 = sbr.rel (!%p43_p3) target bundleno = 36 (0x24), region = 217 }
0x1238   :  { %2693 = vsyncpa [#allocation4], 1 }
0x1239   :  { %2695 = vsyncpa [#allocation4 + $0x1], 1 }
0x123a   :  { %2696 = vsyncpa [#allocation7], 1 }
0x123b   :  { %2697 = vsyncpa [#allocation10], 1 }
0x123c   :  { %2698 = vsyncpa [#allocation13], 1 }
0x123d   :  { %2699 = vsyncpa [#allocation16], 1 }
0x123e   :  { %2700 = vsyncpa [#allocation19], 1 }
0x123f   :  { %2701 = vsyncpa [#allocation5], 1 }
0x1240   :  { %2703 = vsyncpa [#allocation5 + $0x1], 1 }

</bundles_post_ra>
